<compile_context>
chip_gen: v6e
topology: v6e:2x2x1
jax: 0.10.0
libtpu: 0.0.40
codegen_flags: <defaults>
</compile_context>

<pallas_src>
import functools

import numpy as np
import jax
import jax.numpy as jnp
from jax import lax
from jax.experimental import pallas as pl
from jax.experimental.pallas import tpu as pltpu


# ----------------------------------------------------------------------------
# deterministic filter parameters (kornia semantics)
# ----------------------------------------------------------------------------
GAUSS_K, GAUSS_SIGMA = 9, 8.0
LAP_K = 21
LAP_PAD = LAP_K // 2                                   # laplacian halo = 10
# kornia laplacian kernel: ones(K,K) with centre = 1 - K^2, normalized=True
# => conv = (box_conv - K^2 * x) / (2 * (K^2 - 1))
LAP_CENTER = -float(LAP_K * LAP_K)                     # -441
LAP_SCALE = 1.0 / (2.0 * (LAP_K * LAP_K - 1))          # 1/880
LAP_C2 = LAP_CENTER * LAP_SCALE
MXU_PREC = lax.Precision.HIGHEST


def _gaussian_kernel1d(ksize: int, sigma: float) -> np.ndarray:
    # matches kornia.filters.get_gaussian_kernel1d
    x = np.arange(ksize, dtype=np.float64) - ksize // 2
    if ksize % 2 == 0:
        x = x + 0.5
    g = np.exp(-(x ** 2) / (2.0 * sigma ** 2))
    return g / g.sum()


def _axis_operator(dim: int, k1d: np.ndarray) -> np.ndarray:
    """(dim, dim) matrix = reflect-pad(p) + 1-D correlation along one axis."""
    K = len(k1d)
    p = K // 2
    assert dim > p, "reflect padding requires dim > kernel_size // 2"
    A = np.zeros((dim, dim), np.float64)
    for o in range(dim):
        for j in range(K):
            i = o + j - p
            if i < 0:
                i = -i                       # mirror (no edge repeat)
            elif i >= dim:
                i = 2 * dim - 2 - i
            A[o, i] += k1d[j]
    return A


# ----------------------------------------------------------------------------
# fused Laplacian-of-Gaussian kernel: 6 MXU matmuls + 2 axpys per step
# x layout: (H, L) with L = T*W lanes (T images packed side-by-side)
# ----------------------------------------------------------------------------
def _log_mxu_kernel(x_ref, gw_ref, bw_ref, gh_ref, bhs_ref, o_ref):
    x = x_ref[...].astype(jnp.float32)
    gw = gw_ref[...]          # (L, L)  block-diag gaussian W-axis operator
    bw = bw_ref[...]          # (L, L)  block-diag box(21)  W-axis operator
    gh = gh_ref[...]          # (H, H)  gaussian H-axis operator
    bhs = bhs_ref[...]        # (H, H)  LAP_SCALE * box(21) H-axis operator

    def rowcol(m_left, a, m_right):
        t = jnp.dot(a, m_right, precision=MXU_PREC,
                    preferred_element_type=jnp.float32)
        return jnp.dot(m_left, t, precision=MXU_PREC,
                       preferred_element_type=jnp.float32)

    g = rowcol(gh, x, gw)                        # gaussian_blur2d(9, sigma=8)
    l1 = rowcol(bhs, g, bw) + LAP_C2 * g         # laplacian(21), normalized
    l2 = rowcol(bhs, l1, bw) + LAP_C2 * l1       # laplacian(21) again
    o_ref[...] = l2.astype(o_ref.dtype)


def _vmem_block_bytes(H: int, L: int) -> int:
    # 2x double-buffered in/out blocks + 2x (conservative) operator matrices
    # + compiler-internal headroom.
    words = 2 * 2 * H * L + 2 * (2 * L * L + 2 * H * H)
    return 4 * words + (2 << 20)


def _vmem_budget_bytes() -> int:
    try:
        cap = int(pltpu.get_tpu_info().vmem_capacity_bytes)
    except Exception:
        cap = 64 * 2 ** 20            # conservative (v7x) fallback
    return int(0.8 * cap)


def _choose_image_tile(N: int, W: int, H: int, budget: int) -> int:
    """Largest divisor T of N whose tile is lane-dense (T*W % 128 == 0) and
    fits the VMEM budget; falls back to the full-width block (T == N)."""
    fallback = None
    for T in range(N, 0, -1):
        if N % T:
            continue
        if _vmem_block_bytes(H, T * W) > budget:
            continue
        if (T * W) % 128 == 0:
            return T
        if T == N:
            fallback = T              # full minor dim -> always a legal block
    if fallback is not None:
        return fallback
    raise ValueError("LaplacianGuide: no image tile fits the VMEM budget")


def get_laplacian(x):
    """Pallas version of LaplacianGuide._get_laplacian (NCHW float)."""
    B, C, H, W = x.shape
    assert H > LAP_PAD and W > LAP_PAD, "LaplacianGuide requires H, W >= 11"
    N = B * C

    budget = _vmem_budget_bytes()
    T = _choose_image_tile(N, W, H, budget)
    L = T * W

    # host-side per-axis operators (reflect padding folded in)
    g1d = _gaussian_kernel1d(GAUSS_K, GAUSS_SIGMA)
    ones = np.ones((LAP_K,), np.float64)
    gh = _axis_operator(H, g1d)
    gw = _axis_operator(W, g1d)
    bh = _axis_operator(H, ones)
    bw = _axis_operator(W, ones)

    eye_t = np.eye(T)
    gw_bd = jnp.asarray(np.kron(eye_t, gw.T), jnp.float32)     # (L, L)
    bw_bd = jnp.asarray(np.kron(eye_t, bw.T), jnp.float32)     # (L, L)
    gh_m = jnp.asarray(gh, jnp.float32)                        # (H, H)
    bhs_m = jnp.asarray(LAP_SCALE * bh, jnp.float32)           # (H, H)

    # lane-dense packing (layout plumbing only): lane index = image*W + col
    xf = jnp.transpose(x.reshape(N, H, W), (1, 0, 2)).reshape(H, N * W)

    vmem_limit = int(min(budget, max(_vmem_block_bytes(H, L), 32 * 2 ** 20)))

    out = pl.pallas_call(
        _log_mxu_kernel,
        out_shape=jax.ShapeDtypeStruct((H, N * W), x.dtype),
        grid_spec=pltpu.PrefetchScalarGridSpec(
            num_scalar_prefetch=0,
            grid=(N // T,),
            in_specs=[
                pl.BlockSpec((H, L), lambda n: (0, n)),
                pl.BlockSpec((L, L), lambda n: (0, 0)),
                pl.BlockSpec((L, L), lambda n: (0, 0)),
                pl.BlockSpec((H, H), lambda n: (0, 0)),
                pl.BlockSpec((H, H), lambda n: (0, 0)),
            ],
            out_specs=pl.BlockSpec((H, L), lambda n: (0, n)),
        ),
        compiler_params=pltpu.CompilerParams(
            dimension_semantics=("parallel",),     # shards across TCs on v7x
            vmem_limit_bytes=vmem_limit),
    )(xf, gw_bd, bw_bd, gh_m, bhs_m)

    return jnp.transpose(out.reshape(H, N, W), (1, 0, 2)).reshape(B, C, H, W)


# ----------------------------------------------------------------------------
# mask multiply on the gradient copy (only batch 0 is masked), lane-dense
# (replicates: for i in range(C): grad_copy[0][i] *= mask[0][0])
# ----------------------------------------------------------------------------
def _mask_kernel(g_ref, m_ref, o_ref, *, batch0_rows):
    g = g_ref[...]
    rows = lax.broadcasted_iota(jnp.int32, g.shape, 0)
    m = jnp.broadcast_to(m_ref[...], g.shape).astype(g.dtype)
    o_ref[...] = jnp.where(rows < batch0_rows, g * m, g)


def apply_mask(grad, mask):
    B, C, H, W = grad.shape
    HW = H * W
    g2 = grad.reshape(B * C, HW)                  # minor dim = H*W (>=128)
    m2 = mask.reshape(1, HW).astype(grad.dtype)
    out = pl.pallas_call(
        functools.partial(_mask_kernel, batch0_rows=C),
        out_shape=jax.ShapeDtypeStruct((B * C, HW), grad.dtype),
        grid_spec=pltpu.PrefetchScalarGridSpec(
            num_scalar_prefetch=0,
            grid=(1,),
            in_specs=[pl.BlockSpec((B * C, HW), lambda n: (0, 0)),
                      pl.BlockSpec((1, HW), lambda n: (0, 0))],
            out_specs=pl.BlockSpec((B * C, HW), lambda n: (0, 0)),
        ),
        compiler_params=pltpu.CompilerParams(
            dimension_semantics=("arbitrary",)),
    )(g2, m2)
    return out.reshape(B, C, H, W)


# ----------------------------------------------------------------------------
# pure-JAX reference (depthwise lax.conv) for a correctness check
# ----------------------------------------------------------------------------
def _ref_sep_filter(x, k1d, center_coeff, scale):
    B, C, H, W = x.shape
    K = len(k1d)
    p = K // 2
    xp = jnp.pad(x, ((0, 0), (0, 0), (p, p), (p, p)), mode="reflect")
    k2d = jnp.asarray(np.outer(k1d, k1d), x.dtype)
    kern = jnp.tile(k2d[None, None], (C, 1, 1, 1))
    y = lax.conv_general_dilated(
        xp, kern, (1, 1), "VALID",
        dimension_numbers=("NCHW", "OIHW", "NCHW"), feature_group_count=C,
        precision=lax.Precision.HIGHEST)
    return scale * (y + center_coeff * x)


def _ref_get_laplacian(x):
    g1d = _gaussian_kernel1d(GAUSS_K, GAUSS_SIGMA).astype(np.float32)
    ones1d = np.ones((LAP_K,), np.float32)
    y = _ref_sep_filter(x, g1d, 0.0, 1.0)
    y = _ref_sep_filter(y, ones1d, LAP_CENTER, LAP_SCALE)
    y = _ref_sep_filter(y, ones1d, LAP_CENTER, LAP_SCALE)
    return y


# ----------------------------------------------------------------------------
if __name__ == "__main__":
    key = jax.random.PRNGKey(0)
    k1, k2 = jax.random.split(key)

    B, C, H, W = 2, 4, 16, 16
    x = jax.random.uniform(k1, (B, C, H, W), dtype=jnp.float32)       # opt_tensor
    mask = jax.random.uniform(k2, (1, 1, H, W), dtype=jnp.float32)    # self.mask

    # prepare()/forward hot path: fused Laplacian-of-Gaussian
    lap = jax.block_until_ready(get_laplacian(x))
    ref = jax.block_until_ready(_ref_get_laplacian(x))
    assert lap.shape == (B, C, H, W) and lap.dtype == jnp.float32
    np.testing.assert_allclose(np.asarray(lap), np.asarray(ref),
                               rtol=2e-3, atol=2e-4)

    # mask application on the gradient copy (the Laplacian output stands in
    # for opt_tensor.grad; VGG + MipMSELoss + backward are not reproduced).
    grad_copy = jax.block_until_ready(apply_mask(lap, mask))
    expected = np.asarray(lap).copy()
    expected[0] *= np.asarray(mask)[0, 0]
    np.testing.assert_allclose(np.asarray(grad_copy), expected,
                               rtol=1e-5, atol=1e-6)

    print("KERNEL_OK")
</pallas_src>

<mosaic_0001>
module attributes {stable_mosaic.version = 11 : i64} {
  func.func @_log_mxu_kernel(%arg0: i32, %arg1: memref<16x128xf32, #tpu.memory_space<vmem>>, %arg2: memref<128x128xf32, #tpu.memory_space<vmem>>, %arg3: memref<128x128xf32, #tpu.memory_space<vmem>>, %arg4: memref<16x16xf32, #tpu.memory_space<vmem>>, %arg5: memref<16x16xf32, #tpu.memory_space<vmem>>, %arg6: memref<16x128xf32, #tpu.memory_space<vmem>>) attributes {dimension_semantics = [#tpu.dimension_semantics<parallel>], iteration_bounds = array<i64: 1>, scalar_prefetch = 0 : i64, scratch_operands = 0 : i64, tpu.core_type = #tpu.core_type<tc>, window_params = [{transform_indices = @transform_0, window_bounds = array<i64: 16, 128>}, {pipeline_mode = #tpu.pipeline_mode<synchronous>, transform_indices = @transform_1, window_bounds = array<i64: 128, 128>}, {pipeline_mode = #tpu.pipeline_mode<synchronous>, transform_indices = @transform_2, window_bounds = array<i64: 128, 128>}, {pipeline_mode = #tpu.pipeline_mode<synchronous>, transform_indices = @transform_3, window_bounds = array<i64: 16, 16>}, {pipeline_mode = #tpu.pipeline_mode<synchronous>, transform_indices = @transform_4, window_bounds = array<i64: 16, 16>}, {transform_indices = @transform_5, window_bounds = array<i64: 16, 128>}]} {
    %c0 = arith.constant 0 : index
    %c0_0 = arith.constant 0 : index
    %0 = vector.load %arg1[%c0, %c0_0] : memref<16x128xf32, #tpu.memory_space<vmem>>, vector<16x128xf32>
    %c0_1 = arith.constant 0 : index
    %c0_2 = arith.constant 0 : index
    %1 = vector.load %arg2[%c0_1, %c0_2] : memref<128x128xf32, #tpu.memory_space<vmem>>, vector<128x128xf32>
    %c0_3 = arith.constant 0 : index
    %c0_4 = arith.constant 0 : index
    %2 = vector.load %arg3[%c0_3, %c0_4] : memref<128x128xf32, #tpu.memory_space<vmem>>, vector<128x128xf32>
    %c0_5 = arith.constant 0 : index
    %c0_6 = arith.constant 0 : index
    %3 = vector.load %arg4[%c0_5, %c0_6] : memref<16x16xf32, #tpu.memory_space<vmem>>, vector<16x16xf32>
    %c0_7 = arith.constant 0 : index
    %c0_8 = arith.constant 0 : index
    %4 = vector.load %arg5[%c0_7, %c0_8] : memref<16x16xf32, #tpu.memory_space<vmem>>, vector<16x16xf32>
    %cst = arith.constant dense<0.000000e+00> : vector<16x128xf32>
    %5 = tpu.matmul %0, %1, %cst {dimension_numbers = #tpu.dot_dimension_numbers<[1], [0], [0], [1], [0, 0, 1, 1], [], []>, precision = #tpu.contract_precision<fp32>} : vector<16x128xf32>, vector<128x128xf32>, vector<16x128xf32> -> vector<16x128xf32>
    %cst_9 = arith.constant dense<0.000000e+00> : vector<16x128xf32>
    %6 = tpu.matmul %3, %5, %cst_9 {dimension_numbers = #tpu.dot_dimension_numbers<[1], [0], [0], [1], [0, 0, 1, 1], [], []>, precision = #tpu.contract_precision<fp32>} : vector<16x16xf32>, vector<16x128xf32>, vector<16x128xf32> -> vector<16x128xf32>
    %cst_10 = arith.constant dense<0.000000e+00> : vector<16x128xf32>
    %7 = tpu.matmul %6, %2, %cst_10 {dimension_numbers = #tpu.dot_dimension_numbers<[1], [0], [0], [1], [0, 0, 1, 1], [], []>, precision = #tpu.contract_precision<fp32>} : vector<16x128xf32>, vector<128x128xf32>, vector<16x128xf32> -> vector<16x128xf32>
    %cst_11 = arith.constant dense<0.000000e+00> : vector<16x128xf32>
    %8 = tpu.matmul %4, %7, %cst_11 {dimension_numbers = #tpu.dot_dimension_numbers<[1], [0], [0], [1], [0, 0, 1, 1], [], []>, precision = #tpu.contract_precision<fp32>} : vector<16x16xf32>, vector<16x128xf32>, vector<16x128xf32> -> vector<16x128xf32>
    %cst_12 = arith.constant -0.501136363 : f32
    %9 = vector.broadcast %cst_12 : f32 to vector<16x128xf32>
    %10 = arith.mulf %9, %6 : vector<16x128xf32>
    %11 = arith.addf %8, %10 : vector<16x128xf32>
    %cst_13 = arith.constant dense<0.000000e+00> : vector<16x128xf32>
    %12 = tpu.matmul %11, %2, %cst_13 {dimension_numbers = #tpu.dot_dimension_numbers<[1], [0], [0], [1], [0, 0, 1, 1], [], []>, precision = #tpu.contract_precision<fp32>} : vector<16x128xf32>, vector<128x128xf32>, vector<16x128xf32> -> vector<16x128xf32>
    %cst_14 = arith.constant dense<0.000000e+00> : vector<16x128xf32>
    %13 = tpu.matmul %4, %12, %cst_14 {dimension_numbers = #tpu.dot_dimension_numbers<[1], [0], [0], [1], [0, 0, 1, 1], [], []>, precision = #tpu.contract_precision<fp32>} : vector<16x16xf32>, vector<16x128xf32>, vector<16x128xf32> -> vector<16x128xf32>
    %cst_15 = arith.constant -0.501136363 : f32
    %14 = vector.broadcast %cst_15 : f32 to vector<16x128xf32>
    %15 = arith.mulf %14, %11 : vector<16x128xf32>
    %16 = arith.addf %13, %15 : vector<16x128xf32>
    %c0_16 = arith.constant 0 : index
    %c0_17 = arith.constant 0 : index
    %17 = vector.load %arg6[%c0_16, %c0_17] : memref<16x128xf32, #tpu.memory_space<vmem>>, vector<16x128xf32>
    tpu.vector_store %arg6[%c0_16, %c0_17], %16 {strides = array<i32>} : memref<16x128xf32, #tpu.memory_space<vmem>>, vector<16x128xf32>,
    return
  }
  func.func @transform_0(%arg0: i32) -> (i32, i32) {
    %c0_i32 = arith.constant 0 : i32
    %c0_i32_0 = arith.constant 0 : i32
    return %c0_i32, %arg0 : i32, i32
  }
  func.func @transform_1(%arg0: i32) -> (i32, i32) {
    %c0_i32 = arith.constant 0 : i32
    %c0_i32_0 = arith.constant 0 : i32
    %c0_i32_1 = arith.constant 0 : i32
    return %c0_i32, %c0_i32_0 : i32, i32
  }
  func.func @transform_2(%arg0: i32) -> (i32, i32) {
    %c0_i32 = arith.constant 0 : i32
    %c0_i32_0 = arith.constant 0 : i32
    %c0_i32_1 = arith.constant 0 : i32
    return %c0_i32, %c0_i32_0 : i32, i32
  }
  func.func @transform_3(%arg0: i32) -> (i32, i32) {
    %c0_i32 = arith.constant 0 : i32
    %c0_i32_0 = arith.constant 0 : i32
    %c0_i32_1 = arith.constant 0 : i32
    return %c0_i32, %c0_i32_0 : i32, i32
  }
  func.func @transform_4(%arg0: i32) -> (i32, i32) {
    %c0_i32 = arith.constant 0 : i32
    %c0_i32_0 = arith.constant 0 : i32
    %c0_i32_1 = arith.constant 0 : i32
    return %c0_i32, %c0_i32_0 : i32, i32
  }
  func.func @transform_5(%arg0: i32) -> (i32, i32) {
    %c0_i32 = arith.constant 0 : i32
    %c0_i32_0 = arith.constant 0 : i32
    return %c0_i32, %arg0 : i32, i32
  }
}

</mosaic_0001>

<bundles_post_ra>
// kernel: tpu_custom_call.1
= control target key start
LH: loop header
LB: loop body
LE: loop exit
PB: predicated region body
PF: predicated region fallthrough
CT: control target
= control target key end

     0   :  { %10 = vsyncpa [#allocation3], 0  ;;  %s6173_s0 = inlined_call_operand.hbm [shape: f32[16,128], index: 0, kind: input, shape index: {}]   ;;  %s6174_s1 = inlined_call_operand.hbm [shape: f32[128,128], index: 1, kind: input, shape index: {}]   ;;  %s6175_s2 = inlined_call_operand.hbm [shape: f32[128,128], index: 2, kind: input, shape index: {}]   ;;  %s6176_s3 = inlined_call_operand.hbm [shape: f32[16,16], index: 3, kind: input, shape index: {}]   ;;  %s6177_s4 = inlined_call_operand.hbm [shape: f32[16,16], index: 4, kind: input, shape index: {}]   ;;  %s6178_s5 = inlined_call_operand.hbm [shape: f32[16,128], index: 5, kind: output, shape index: {}]  }
   0x1   :  { %11 = vsyncpa [#allocation6], 0 }
   0x2   :  { %12 = vsyncpa [#allocation9], 0 }
   0x3   :  { %13 = vsyncpa [#allocation4], 0  ;;  %s5011_s18 = smov [#allocation5]   ;;  %s5012_s20 = smov [#allocation8]  }
   0x4   :  { %s31_s19 = sshll.u32 %s5011_s18, 4  ;;  %s55_s21 = sshll.u32 %s5012_s20, 4  ;;  %s32_s19 = int_to_ptr.vmem [resolvable:$true] %s31_s19  ;;  %s56_s21 = int_to_ptr.vmem [resolvable:$true] %s55_s21 }
   0x5   :  { %s4891_s22 = scalar_lea.vmem %s32_s19, 2048  ;;  %p4896_p1 = scmp.lt.s32.totalorder %s32_s19, %s32_s19 }
   0x6   :  { %p4892_p0 = scmp.ne.s32.totalorder %s32_s19, %s4891_s22  ;;  %p4897_p2 = scmp.lt.s32.totalorder %s4891_s22, %s4891_s22 }
   0x8   :  { %p4898_p3 = por %p4897_p2, %p4896_p1 }
   0xa   :  { %p4899_p4 = pnand %p4898_p3, %p4892_p0 }
   0xc   :  { %4902 = shalt.err (!%p4899_p4)
}
   0xd   :  { %s5013_s23 = smov 128   ;;  %s5014_s24 = smov 8  }
   0xe   :  { %37 = dma.hbm_to_vmem [thread:$0]  %s6174_s1, 2048, %s32_s19, [#allocation6], %s5013_s23, %s5013_s23, %s5014_s24  }
   0xf   :  { %s4911_s27 = scalar_lea.vmem %s56_s21, 256  ;;  %p4916_p6 = scmp.lt.s32.totalorder %s56_s21, %s56_s21 }
  0x10   :  { %p4912_p5 = scmp.ne.s32.totalorder %s56_s21, %s4911_s27  ;;  %p4917_p7 = scmp.lt.s32.totalorder %s4911_s27, %s4911_s27 }
  0x12   :  { %p4918_p8 = por %p4917_p7, %p4916_p6 }
  0x14   :  { %p4919_p9 = pnand %p4918_p8, %p4912_p5 }
  0x16   :  { %4922 = shalt.err (!%p4919_p9)
}
  0x17   :  { %61 = dma.hbm_to_vmem [thread:$0]  %s6176_s3, 256, %s56_s21, [#allocation9], %s5013_s23, %s5013_s23, %s5014_s24  }
  0x18   :  { %s5015_s30 = smov [#allocation2]   ;;  %s5016_s7 = smov [#allocation7]  }
  0x19   :  { %s19_s6 = sshll.u32 %s5015_s30, 4  ;;  %s43_s8 = sshll.u32 %s5016_s7, 4  ;;  %s20_s6 = int_to_ptr.vmem [resolvable:$true] %s19_s6  ;;  %s44_s8 = int_to_ptr.vmem [resolvable:$true] %s43_s8 }
  0x1a   :  { %s4931_s1 = scalar_lea.vmem %s20_s6, 256  ;;  %p4936_p11 = scmp.lt.s32.totalorder %s20_s6, %s20_s6 }
  0x1b   :  { %p4932_p10 = scmp.ne.s32.totalorder %s20_s6, %s4931_s1  ;;  %p4937_p12 = scmp.lt.s32.totalorder %s4931_s1, %s4931_s1 }
  0x1d   :  { %p4938_p13 = por %p4937_p12, %p4936_p11 }
  0x1f   :  { %p4939_p0 = pnand %p4938_p13, %p4932_p10 }
  0x21   :  { %4942 = shalt.err (!%p4939_p0)
}
  0x22   :  { %25 = dma.hbm_to_vmem [thread:$0]  %s6173_s0, 256, %s20_s6, [#allocation3], %s5013_s23, %s5013_s23, %s5014_s24  }
  0x23   :  { %s4951_s3 = scalar_lea.vmem %s44_s8, 2048  ;;  %p4956_p2 = scmp.lt.s32.totalorder %s44_s8, %s44_s8 }
  0x24   :  { %p4952_p1 = scmp.ne.s32.totalorder %s44_s8, %s4951_s3  ;;  %p4957_p3 = scmp.lt.s32.totalorder %s4951_s3, %s4951_s3 }
  0x26   :  { %p4958_p4 = por %p4957_p3, %p4956_p2 }
  0x28   :  { %p4959_p5 = pnand %p4958_p4, %p4952_p1 }
  0x2a   :  { %4962 = shalt.err (!%p4959_p5)
}
  0x2b   :  { %49 = dma.hbm_to_vmem [thread:$0]  %s6175_s2, 2048, %s44_s8, [#allocation6], %s5013_s23, %s5013_s23, %s5014_s24  }
  0x2c   :  { %s5017_s13 = smov [#allocation10]  }
  0x2d   :  { %s67_s14 = sshll.u32 %s5017_s13, 4  ;;  %s68_s14 = int_to_ptr.vmem [resolvable:$true] %s67_s14 }
  0x2e   :  { %s4971_s15 = scalar_lea.vmem %s68_s14, 256  ;;  %p4976_p7 = scmp.lt.s32.totalorder %s68_s14, %s68_s14 }
  0x2f   :  { %p4972_p6 = scmp.ne.s32.totalorder %s68_s14, %s4971_s15  ;;  %p4977_p8 = scmp.lt.s32.totalorder %s4971_s15, %s4971_s15 }
  0x31   :  { %p4978_p9 = por %p4977_p8, %p4976_p7 }
  0x33   :  { %p4979_p10 = pnand %p4978_p9, %p4972_p6 }
  0x35   :  { %4982 = shalt.err (!%p4979_p10)
}
  0x36   :  { %73 = dma.hbm_to_vmem [thread:$0]  %s6177_s4, 256, %s68_s14, [#allocation9], %s5013_s23, %s5013_s23, %s5014_s24  }
  0x37   :  { %5003 = dma.done.wait [#allocation3], 256  }
  0x38   :  { %5004 = vsyncadd [#allocation3], 4294967040 }
  0x39   :  { %5005 = dma.done.wait [#allocation6], 4096  }
  0x3a   :  { %5006 = vsyncadd [#allocation6], 4294963200 }
  0x3b   :  { %5007 = dma.done.wait [#allocation9], 512  }
  0x3c   :  { %5008 = vsyncadd [#allocation9], 4294966784  ;;  %v106_v0 = vld [vmem:[#allocation5 + $0x78] sm:$0xff]  ;;  %v105_v1 = vld [vmem:[#allocation5 + $0x70] sm:$0xff]  ;;  %vm811_vm0 = vcmask 130048   ;;  %s5018_s2 = smov [#allocation11]  }
  0x3d   :  { %v104_v2 = vld [vmem:[#allocation5 + $0x68] sm:$0xff]  ;;  %v5079_v3 = vand.u32 4294901760, %v106_v0  ;;  %v5081_v4 = vand.u32 4294901760, %v105_v1  ;;  %v103_v6 = vld [vmem:[#allocation5 + $0x60] sm:$0xff]  ;;  %v102_v7 = vld [vmem:[#allocation5 + $0x58] sm:$0xff]  ;;  %s3709_s4 = sshll.u32 %s5018_s2, 4  ;;  %s3710_s4 = int_to_ptr.vmem [resolvable:$true] %s3709_s4 }
  0x3e   :  { %v5083_v5 = vand.u32 4294901760, %v104_v2  ;;  %v101_v8 = vld [vmem:[#allocation5 + $0x50] sm:$0xff]  ;;  %v5085_v9 = vand.u32 4294901760, %v103_v6  ;;  %v5087_v10 = vand.u32 4294901760, %v102_v7  ;;  %v100_v12 = vld [vmem:[#allocation5 + $0x48] sm:$0xff]  ;;  %v99_v13 = vld [vmem:[#allocation5 + $0x40] sm:$0xff]  ;;  %p4988_p12 = scmp.lt.s32.totalorder %s3710_s4, %s3710_s4 }
  0x3f   :  { %v5089_v11 = vand.u32 4294901760, %v101_v8  ;;  %4119 = vmatprep.subr.mxu0 %v5079_v3  ;;  %v5093_v14 = vsub.f32 %v106_v0, %v5079_v3  ;;  %v5096_v15 = vsub.f32 %v105_v1, %v5081_v4  ;;  %v5098_v16 = vand.u32 4294901760, %v100_v12  ;;  %v98_v18 = vld [vmem:[#allocation5 + $0x38] sm:$0xff]  ;;  %v97_v25 = vld [vmem:[#allocation5 + $0x30] sm:$0xff]  ;;  %v96_v35 = vld [vmem:[#allocation5 + $0x28] sm:$0xff]  ;;  %s4983_s17 = scalar_lea.vmem %s3710_s4, 256 }
  0x40   :  { %v5101_v17 = vsub.f32 %v104_v2, %v5083_v5  ;;  %4120 = vmatpush3.msra.mxu0 %v5079_v3  ;;  %v5105_v19 = vsub.f32 %v103_v6, %v5085_v9  ;;  %v5108_v20 = vsub.f32 %v102_v7, %v5087_v10  ;;  %v5120_v24 = vand.u32 4294901760, %v99_v13  ;;  %v95_v40 = vld [vmem:[#allocation5 + $0x20] sm:$0xff]  ;;  %v94_v48 = vld [vmem:[#allocation5 + $0x18] sm:$0xff]  ;;  %v89_v49 = vld [vmem:[#allocation2] sm:$0xff]  ;;  %p4984_p11 = scmp.ne.s32.totalorder %s3710_s4, %s4983_s17  ;;  %p4989_p13 = scmp.lt.s32.totalorder %s4983_s17, %s4983_s17 }
  0x41   :  { %4121 = vmatprep.subr.mxu0 %v5081_v4  ;;  %v5112_v21 = vand.u32 4294901760, %v5093_v14  ;;  %v5115_v22 = vand.u32 4294901760, %v5096_v15  ;;  %v5126_v27 = vand.u32 4294901760, %v98_v18  ;;  %v5132_v29 = vsub.f32 %v101_v8, %v5089_v11  ;;  %v90_v54 = vld [vmem:[#allocation2 + $0x8] sm:$0xff]  ;;  %v93_v59 = vld [vmem:[#allocation5 + $0x10] sm:$0xff]  ;;  %v92_v2 = vld [vmem:[#allocation5 + $0x8] sm:$0xff] }
  0x42   :  { %v5118_v23 = vand.u32 4294901760, %v5101_v17  ;;  %4122 = vmatpush3.msra.mxu0 %v5081_v4  ;;  %v5124_v26 = vand.u32 4294901760, %v5105_v19  ;;  %v5129_v28 = vand.u32 4294901760, %v5108_v20  ;;  %v5142_v33 = vsub.f32 %v100_v12, %v5098_v16  ;;  %p4990_p0 = por %p4989_p13, %p4988_p12 }
  0x43   :  { %4123 = vmatprep.subr.mxu0 %v5083_v5  ;;  %v232_v30 = vsub.f32 %v5093_v14, %v5112_v21  ;;  %v239_v31 = vsub.f32 %v5096_v15, %v5115_v22  ;;  %v5145_v34 = vand.u32 4294901760, %v97_v25  ;;  %v5151_v39 = vand.u32 4294901760, %v5132_v29 }
  0x44   :  { %v246_v32 = vsub.f32 %v5101_v17, %v5118_v23  ;;  %4124 = vmatpush3.msra.mxu0 %v5083_v5  ;;  %v253_v38 = vsub.f32 %v5105_v19, %v5124_v26  ;;  %v260_v41 = vsub.f32 %v5108_v20, %v5129_v28  ;;  %v5157_v42 = vand.u32 4294901760, %v5142_v33  ;;  %p4991_p1 = pnand %p4990_p0, %p4984_p11 }
  0x45   :  { %4125 = vmatprep.subr.mxu0 %v5085_v9  ;;  %v233_v36 = vand.u32 4294901760, %v232_v30  ;;  %v240_v37 = vand.u32 4294901760, %v239_v31  ;;  %v5160_v43 = vsub.f32 %v99_v13, %v5120_v24  ;;  %v5163_v45 = vand.u32 4294901760, %v96_v35 }
  0x46   :  { %4126 = vmatpush3.msra.mxu0 %v5085_v9  ;;  %v247_v44 = vand.u32 4294901760, %v246_v32  ;;  %v5166_v46 = vsub.f32 %v98_v18, %v5126_v27  ;;  %v5169_v47 = vand.u32 4294901760, %v95_v40  ;;  %v254_v50 = vand.u32 4294901760, %v253_v38  ;;  %v91_v18 = vld [vmem:[#allocation5] sm:$0xff] }
  0x47   :  { %4127 = vmatprep.subr.mxu0 %v5087_v10  ;;  %4154 = vmatprep.subr.mxu1 %v233_v36  ;;  %v267_v51 = vsub.f32 %v5132_v29, %v5151_v39  ;;  %v5175_v52 = vand.u32 4294901760, %v5160_v43  ;;  %v5178_v53 = vsub.f32 %v97_v25, %v5145_v34  ;;  %v261_v55 = vand.u32 4294901760, %v260_v41 }
  0x48   :  { %4128 = vmatpush3.msra.mxu0 %v5087_v10  ;;  %4155 = vmatpush3.msra.mxu1 %v233_v36  ;;  %v274_v56 = vsub.f32 %v5142_v33, %v5157_v42  ;;  %v5184_v57 = vand.u32 4294901760, %v94_v48  ;;  %v5187_v58 = vand.u32 4294901760, %v5166_v46  ;;  %v5190_v60 = vsub.f32 %v96_v35, %v5163_v45 }
  0x49   :  { %4129 = vmatprep.subr.mxu0 %v5089_v11  ;;  %4156 = vmatprep.subr.mxu1 %v240_v37  ;;  %v5192_v61 = vand.u32 4294901760, %v89_v49  ;;  %v5195_v62 = vand.u32 4294901760, %v90_v54  ;;  %v268_v63 = vand.u32 4294901760, %v267_v51  ;;  %v281_v0 = vsub.f32 %v5160_v43, %v5175_v52 }
  0x4a   :  { %4130 = vmatpush3.msra.mxu0 %v5089_v11  ;;  %4157 = vmatpush3.msra.mxu1 %v240_v37  ;;  %v5201_v1 = vand.u32 4294901760, %v5178_v53  ;;  %v5204_v6 = vsub.f32 %v95_v40, %v5169_v47  ;;  %v275_v7 = vand.u32 4294901760, %v274_v56  ;;  %v5207_v8 = vand.u32 4294901760, %v93_v59 }
  0x4b   :  { %4131 = vmatprep.subr.mxu0 %v5098_v16  ;;  %4158 = vmatprep.subr.mxu1 %v247_v44  ;;  %v288_v12 = vsub.f32 %v5166_v46, %v5187_v58  ;;  %v5213_v13 = vand.u32 4294901760, %v5190_v60  ;;  %v5216_v25 = vsub.f32 %v89_v49, %v5192_v61  ;;  %v5219_v30 = vsub.f32 %v94_v48, %v5184_v57 }
  0x4c   :  { %4132 = vmatpush3.msra.mxu0 %v5098_v16  ;;  %4159 = vmatpush3.msra.mxu1 %v247_v44  ;;  %v5222_v31 = vand.u32 4294901760, %v92_v2  ;;  %v5225_v32 = vsub.f32 %v90_v54, %v5195_v62  ;;  %v282_v35 = vand.u32 4294901760, %v281_v0  ;;  %v295_v36 = vsub.f32 %v5178_v53, %v5201_v1 }
  0x4d   :  { %4133 = vmatprep.subr.mxu0 %v5120_v24  ;;  %4160 = vmatprep.subr.mxu1 %v254_v50  ;;  %v5231_v37 = vand.u32 4294901760, %v5204_v6  ;;  %v5234_v38 = vand.u32 4294901760, %v91_v18  ;;  %v5237_v40 = vsub.f32 %v93_v59, %v5207_v8  ;;  %v289_v41 = vand.u32 4294901760, %v288_v12 }
  0x4e   :  { %4134 = vmatpush3.msra.mxu0 %v5120_v24  ;;  %4161 = vmatpush3.msra.mxu1 %v254_v50  ;;  %v302_v44 = vsub.f32 %v5190_v60, %v5213_v13  ;;  %v6180_v48 = vand.u32 4294901760, %v5216_v25  ;;  %v5244_v49 = vand.u32 4294901760, %v5219_v30  ;;  %v6179_v50 = vand.u32 4294901760, %v5225_v32 }
  0x4f   :  { %4135 = vmatprep.subr.mxu0 %v5126_v27  ;;  %4162 = vmatprep.subr.mxu1 %v261_v55  ;;  %v5249_v51 = vsub.f32 %v92_v2, %v5222_v31  ;;  %v296_v54 = vand.u32 4294901760, %v295_v36  ;;  %v5256_v56 = vand.u32 4294901760, %v5237_v40  ;;  %v5259_v59 = vsub.f32 %v91_v18, %v5234_v38 }
  0x50   :  { %4136 = vmatpush3.msra.mxu0 %v5126_v27  ;;  %4163 = vmatpush3.msra.mxu1 %v261_v55  ;;  %v309_v55 = vsub.f32 %v5204_v6, %v5231_v37  ;;  %v211_v0 = vsub.f32 %v5216_v25, %v6180_v48  ;;  %v316_v2 = vsub.f32 %v5219_v30, %v5244_v49 }
  0x51   :  { %4137 = vmatprep.subr.mxu0 %v5145_v34  ;;  %4164 = vmatprep.subr.mxu1 %v268_v63  ;;  %v5272_v12 = vand.u32 4294901760, %v5249_v51  ;;  %v5279_v36 = vand.u32 4294901760, %v5259_v59 }
  0x52   :  { %4138 = vmatpush3.msra.mxu0 %v5145_v34  ;;  %4165 = vmatpush3.msra.mxu1 %v268_v63  ;;  %v303_v63 = vand.u32 4294901760, %v302_v44  ;;  %v310_v18 = vand.u32 4294901760, %v309_v55  ;;  %v317_v44 = vand.u32 4294901760, %v316_v2 }
  0x53   :  { %4139 = vmatprep.subr.mxu0 %v5163_v45  ;;  %4166 = vmatprep.subr.mxu1 %v275_v7  ;;  %v330_v55 = vsub.f32 %v5249_v51, %v5272_v12  ;;  %v337_v48 = vsub.f32 %v5259_v59, %v5279_v36 }
  0x54   :  { %4140 = vmatpush3.msra.mxu0 %v5163_v45  ;;  %4167 = vmatpush3.msra.mxu1 %v275_v7  ;;  %v221_v7 = vsub.f32 %v5225_v32, %v6179_v50 }
  0x55   :  { %4141 = vmatprep.subr.mxu0 %v5169_v47  ;;  %4168 = vmatprep.subr.mxu1 %v282_v35 }
  0x56   :  { %4142 = vmatpush3.msra.mxu0 %v5169_v47  ;;  %4169 = vmatpush3.msra.mxu1 %v282_v35  ;;  %v323_v35 = vsub.f32 %v5237_v40, %v5256_v56  ;;  %v222_v50 = vand.u32 4294901760, %v221_v7 }
  0x57   :  { %4143 = vmatprep.subr.mxu0 %v5184_v57  ;;  %4170 = vmatprep.subr.mxu1 %v289_v41 }
  0x58   :  { %4144 = vmatpush3.msra.mxu0 %v5184_v57  ;;  %4171 = vmatpush3.msra.mxu1 %v289_v41  ;;  %v212_v41 = vand.u32 4294901760, %v211_v0  ;;  %v338_v0 = vand.u32 4294901760, %v337_v48  ;;  %v120_v48 = vld [vmem:[#allocation7 + $0x68] sm:$0xff] }
  0x59   :  { %4145 = vmatprep.subr.mxu0 %v5207_v8  ;;  %4172 = vmatprep.subr.mxu1 %v296_v54  ;;  %v5468_v2 = vand.u32 4294901760, %v120_v48 }
  0x5a   :  { %4146 = vmatpush3.msra.mxu0 %v5207_v8  ;;  %4173 = vmatpush3.msra.mxu1 %v296_v54  ;;  %v324_v54 = vand.u32 4294901760, %v323_v35 }
  0x5b   :  { %4147 = vmatprep.subr.mxu0 %v5222_v31  ;;  %4174 = vmatprep.subr.mxu1 %v303_v63 }
  0x5c   :  { %4148 = vmatpush3.msra.mxu0 %v5222_v31  ;;  %4175 = vmatpush3.msra.mxu1 %v303_v63  ;;  %v331_v63 = vand.u32 4294901760, %v330_v55 }
  0x5d   :  { %4149 = vmatprep.subr.mxu0 %v5234_v38  ;;  %4176 = vmatprep.subr.mxu1 %v310_v18 }
  0x5e   :  { %4150 = vmatpush3.msra.mxu0 %v5234_v38  ;;  %4177 = vmatpush3.msra.mxu1 %v310_v18  ;;  %v118_v18 = vld [vmem:[#allocation7 + $0x58] sm:$0xff] }
  0x5f   :  { %4151 = vmatprep.mubr.f32.mxu0 %v212_v41  ;;  %4178 = vmatprep.subr.mxu1 %v317_v44 }
  0x60   :  { %4189 = vmatprep.subr.mxu0 %v5093_v14  ;;  %4152 = vmatmul.mubr.f32.vlgmr.msra.gmra.mxu0 %v222_v50 }
  0x61   :  { %4179 = vmatpush3.msra.mxu1 %v317_v44  ;;  %4190 = vmatpush3.msra.mxu0 %v5093_v14  ;;  %v6248_v14 = vand.u32 4294901760, %v5216_v25  ;;  %v117_v44 = vld [vmem:[#allocation7 + $0x50] sm:$0xff] }
  0x62   :  { %4180 = vmatprep.subr.mxu1 %v324_v54  ;;  %4191 = vmatprep.subr.mxu0 %v5096_v15 }
  0x63   :  { %4181 = vmatpush3.msra.mxu1 %v324_v54  ;;  %4192 = vmatpush3.msra.mxu0 %v5096_v15  ;;  %v6249_v15 = vand.u32 4294901760, %v5225_v32  ;;  %v5480_v54 = vsub.f32 %v120_v48, %v5468_v2 }
  0x64   :  { %4182 = vmatprep.subr.mxu1 %v331_v63  ;;  %4193 = vmatprep.subr.mxu0 %v5101_v17 }
  0x65   :  { %4183 = vmatpush3.msra.mxu1 %v331_v63  ;;  %4194 = vmatpush3.msra.mxu0 %v5101_v17  ;;  %v5482_v63 = vand.u32 4294901760, %v118_v18 }
  0x66   :  { %4184 = vmatprep.subr.mxu1 %v338_v0  ;;  %4195 = vmatprep.subr.mxu0 %v5105_v19 }
  0x67   :  { %4185 = vmatpush3.msra.mxu1 %v338_v0  ;;  %4186 = vmatprep.mubr.f32.mxu1 %v5192_v61  ;;  %v116_v0 = vld [vmem:[#allocation7 + $0x48] sm:$0xff] }
  0x68   :  { %4196 = vmatpush3.msra.mxu0 %v5105_v19  ;;  %4187 = vmatmul.mubr.f32.vlgmr.msra.gmra.mxu1 %v5195_v62  ;;  %v124_v19 = vld [vmem:[#allocation8 + $0x8] sm:$0xff] }
  0x69   :  { %4197 = vmatprep.subr.mxu0 %v5108_v20  ;;  %4224 = vmatprep.subr.mxu1 %v5079_v3 }
  0x6a   :  { %4198 = vmatpush3.msra.mxu0 %v5108_v20  ;;  %4225 = vmatpush3.msra.mxu1 %v5079_v3 }
  0x6b   :  { %4199 = vmatprep.subr.mxu0 %v5132_v29  ;;  %4226 = vmatprep.subr.mxu1 %v5081_v4 }
  0x6c   :  { %4200 = vmatpush3.msra.mxu0 %v5132_v29  ;;  %4227 = vmatpush3.msra.mxu1 %v5081_v4 }
  0x6d   :  { %4201 = vmatprep.subr.mxu0 %v5142_v33  ;;  %4228 = vmatprep.subr.mxu1 %v5083_v5 }
  0x6e   :  { %4202 = vmatpush3.msra.mxu0 %v5142_v33  ;;  %4229 = vmatpush3.msra.mxu1 %v5083_v5 }
  0x6f   :  { %4203 = vmatprep.subr.mxu0 %v5160_v43  ;;  %4230 = vmatprep.subr.mxu1 %v5085_v9 }
  0x70   :  { %4204 = vmatpush3.msra.mxu0 %v5160_v43  ;;  %4231 = vmatpush3.msra.mxu1 %v5085_v9 }
  0x71   :  { %4205 = vmatprep.subr.mxu0 %v5166_v46  ;;  %4232 = vmatprep.subr.mxu1 %v5087_v10 }
  0x72   :  { %4206 = vmatpush3.msra.mxu0 %v5166_v46  ;;  %4233 = vmatpush3.msra.mxu1 %v5087_v10 }
  0x73   :  { %4207 = vmatprep.subr.mxu0 %v5178_v53  ;;  %4234 = vmatprep.subr.mxu1 %v5089_v11 }
  0x74   :  { %4208 = vmatpush3.msra.mxu0 %v5178_v53  ;;  %4235 = vmatpush3.msra.mxu1 %v5089_v11 }
  0x75   :  { %4209 = vmatprep.subr.mxu0 %v5190_v60  ;;  %4236 = vmatprep.subr.mxu1 %v5098_v16 }
  0x76   :  { %4210 = vmatpush3.msra.mxu0 %v5190_v60  ;;  %4237 = vmatpush3.msra.mxu1 %v5098_v16 }
  0x77   :  { %4211 = vmatprep.subr.mxu0 %v5204_v6  ;;  %4238 = vmatprep.subr.mxu1 %v5120_v24 }
  0x78   :  { %4212 = vmatpush3.msra.mxu0 %v5204_v6  ;;  %4239 = vmatpush3.msra.mxu1 %v5120_v24 }
  0x79   :  { %4213 = vmatprep.subr.mxu0 %v5219_v30  ;;  %4240 = vmatprep.subr.mxu1 %v5126_v27 }
  0x7a   :  { %4214 = vmatpush3.msra.mxu0 %v5219_v30  ;;  %4241 = vmatpush3.msra.mxu1 %v5126_v27 }
  0x7b   :  { %4215 = vmatprep.subr.mxu0 %v5237_v40  ;;  %4242 = vmatprep.subr.mxu1 %v5145_v34 }
  0x7c   :  { %4216 = vmatpush3.msra.mxu0 %v5237_v40  ;;  %4243 = vmatpush3.msra.mxu1 %v5145_v34 }
  0x7d   :  { %4217 = vmatprep.subr.mxu0 %v5249_v51  ;;  %4244 = vmatprep.subr.mxu1 %v5163_v45 }
  0x7e   :  { %4218 = vmatpush3.msra.mxu0 %v5249_v51  ;;  %4245 = vmatpush3.msra.mxu1 %v5163_v45 }
  0x7f   :  { %4219 = vmatprep.subr.mxu0 %v5259_v59  ;;  %4246 = vmatprep.subr.mxu1 %v5169_v47 }
  0x80   :  { %4220 = vmatpush3.msra.mxu0 %v5259_v59  ;;  %4221 = vmatprep.mubr.f32.mxu0 %v5216_v25 }
  0x81   :  { %4247 = vmatpush3.msra.mxu1 %v5169_v47  ;;  %4222 = vmatmul.mubr.f32.vlgmr.msra.gmra.mxu0 %v5225_v32  ;;  %v121_v32 = vld [vmem:[#allocation7 + $0x70] sm:$0xff] }
  0x82   :  { %4248 = vmatprep.subr.mxu1 %v5184_v57  ;;  %4259 = vmatprep.subr.mxu0 %v5112_v21 }
  0x83   :  { %4249 = vmatpush3.msra.mxu1 %v5184_v57  ;;  %4260 = vmatpush3.msra.mxu0 %v5112_v21 }
  0x84   :  { %4250 = vmatprep.subr.mxu1 %v5207_v8  ;;  %4261 = vmatprep.subr.mxu0 %v5115_v22 }
  0x85   :  { %4251 = vmatpush3.msra.mxu1 %v5207_v8  ;;  %4262 = vmatpush3.msra.mxu0 %v5115_v22  ;;  %v816_v22 = vsel %vm811_vm0, %v124_v19, 0 }
  0x86   :  { %4252 = vmatprep.subr.mxu1 %v5222_v31  ;;  %4263 = vmatprep.subr.mxu0 %v5118_v23 }
  0x87   :  { %4253 = vmatpush3.msra.mxu1 %v5222_v31  ;;  %4264 = vmatpush3.msra.mxu0 %v5118_v23 }
  0x88   :  { %4254 = vmatprep.subr.mxu1 %v5234_v38  ;;  %4265 = vmatprep.subr.mxu0 %v5124_v26 }
  0x89   :  { %4255 = vmatpush3.msra.mxu1 %v5234_v38  ;;  %4256 = vmatprep.mubr.f32.mxu1 %v6248_v14 }
  0x8a   :  { %4266 = vmatpush3.msra.mxu0 %v5124_v26  ;;  %4257 = vmatmul.mubr.f32.vlgmr.msra.gmra.mxu1 %v6249_v15 }
  0x8b   :  { %4267 = vmatprep.subr.mxu0 %v5129_v28  ;;  %4294 = vmatprep.subr.mxu1 %v5079_v3 }
  0x8c   :  { %4268 = vmatpush3.msra.mxu0 %v5129_v28  ;;  %4295 = vmatpush3.msra.mxu1 %v5079_v3  ;;  %v123_v3 = vld [vmem:[#allocation8] sm:$0xff] }
  0x8d   :  { %4269 = vmatprep.subr.mxu0 %v5151_v39  ;;  %4296 = vmatprep.subr.mxu1 %v5081_v4 }
  0x8e   :  { %4270 = vmatpush3.msra.mxu0 %v5151_v39  ;;  %4297 = vmatpush3.msra.mxu1 %v5081_v4  ;;  %v813_v4 = vsel %vm811_vm0, %v123_v3, 0  ;;  %v5490_v3 = vand.u32 4294901760, %v117_v44 }
  0x8f   :  { %4271 = vmatprep.subr.mxu0 %v5157_v42  ;;  %4298 = vmatprep.subr.mxu1 %v5083_v5 }
  0x90   :  { %4272 = vmatpush3.msra.mxu0 %v5157_v42  ;;  %4299 = vmatpush3.msra.mxu1 %v5083_v5  ;;  %v5430_v5 = vand.u32 4294901760, %v813_v4  ;;  %v5516_v19 = vsub.f32 %v117_v44, %v5490_v3 }
  0x91   :  { %4273 = vmatprep.subr.mxu0 %v5175_v52  ;;  %4300 = vmatprep.subr.mxu1 %v5085_v9 }
  0x92   :  { %4274 = vmatpush3.msra.mxu0 %v5175_v52  ;;  %4301 = vmatpush3.msra.mxu1 %v5085_v9  ;;  %v5433_v9 = vsub.f32 %v813_v4, %v5430_v5 }
  0x93   :  { %4275 = vmatprep.subr.mxu0 %v5187_v58  ;;  %4302 = vmatprep.subr.mxu1 %v5087_v10 }
  0x94   :  { %4276 = vmatpush3.msra.mxu0 %v5187_v58  ;;  %4303 = vmatpush3.msra.mxu1 %v5087_v10  ;;  %v887_v10 = vand.u32 4294901760, %v5433_v9 }
  0x95   :  { %4277 = vmatprep.subr.mxu0 %v5201_v1  ;;  %4304 = vmatprep.subr.mxu1 %v5089_v11 }
  0x96   :  { %4278 = vmatpush3.msra.mxu0 %v5201_v1  ;;  %4305 = vmatpush3.msra.mxu1 %v5089_v11  ;;  %v888_v11 = vsub.f32 %v5433_v9, %v887_v10 }
  0x97   :  { %4279 = vmatprep.subr.mxu0 %v5213_v13  ;;  %4306 = vmatprep.subr.mxu1 %v5098_v16 }
  0x98   :  { %4280 = vmatpush3.msra.mxu0 %v5213_v13  ;;  %4307 = vmatpush3.msra.mxu1 %v5098_v16  ;;  %v889_v16 = vand.u32 4294901760, %v888_v11  ;;  %v122_v13 = vld [vmem:[#allocation7 + $0x78] sm:$0xff]  ;;  %v5499_v11 = vand.u32 4294901760, %v5480_v54 }
  0x99   :  { %4281 = vmatprep.subr.mxu0 %v5231_v37  ;;  %4308 = vmatprep.subr.mxu1 %v5120_v24 }
  0x9a   :  { %4282 = vmatpush3.msra.mxu0 %v5231_v37  ;;  %4309 = vmatpush3.msra.mxu1 %v5120_v24  ;;  %v5441_v24 = vand.u32 4294901760, %v816_v22  ;;  %v5457_v37 = vand.u32 4294901760, %v122_v13 }
  0x9b   :  { %4283 = vmatprep.subr.mxu0 %v5244_v49  ;;  %4310 = vmatprep.subr.mxu1 %v5126_v27 }
  0x9c   :  { %4284 = vmatpush3.msra.mxu0 %v5244_v49  ;;  %4311 = vmatpush3.msra.mxu1 %v5126_v27  ;;  %v5444_v33 = vsub.f32 %v816_v22, %v5441_v24  ;;  %v5462_v49 = vand.u32 4294901760, %v121_v32  ;;  %v5466_v59 = vsub.f32 %v122_v13, %v5457_v37 }
  0x9d   :  { %4285 = vmatprep.subr.mxu0 %v5256_v56  ;;  %4312 = vmatprep.subr.mxu1 %v5145_v34 }
  0x9e   :  { %4286 = vmatpush3.msra.mxu0 %v5256_v56  ;;  %4313 = vmatpush3.msra.mxu1 %v5145_v34  ;;  %v119_v56 = vld [vmem:[#allocation7 + $0x60] sm:$0xff]  ;;  %v5471_v35 = vsub.f32 %v121_v32, %v5462_v49  ;;  %v5477_v55 = vand.u32 4294901760, %v5466_v59 }
  0x9f   :  { %4287 = vmatprep.subr.mxu0 %v5272_v12  ;;  %4314 = vmatprep.subr.mxu1 %v5163_v45 }
  0xa0   :  { %4288 = vmatpush3.msra.mxu0 %v5272_v12  ;;  %4315 = vmatpush3.msra.mxu1 %v5163_v45  ;;  %v5485_v14 = vand.u32 4294901760, %v5471_v35  ;;  %v1425_v4 = vsub.f32 %v5466_v59, %v5477_v55 }
  0xa1   :  { %4289 = vmatprep.subr.mxu0 %v5279_v36  ;;  %4316 = vmatprep.subr.mxu1 %v5169_v47 }
  0xa2   :  { %4290 = vmatpush3.msra.mxu0 %v5279_v36  ;;  %4291 = vmatprep.mubr.f32.mxu0 %v5192_v61  ;;  %v5473_v36 = vand.u32 4294901760, %v119_v56 }
  0xa3   :  { %4317 = vmatpush3.msra.mxu1 %v5169_v47  ;;  %4292 = vmatmul.mubr.f32.vlgmr.msra.gmra.mxu0 %v5195_v62  ;;  %v897_v47 = vand.u32 4294901760, %v5444_v33 }
  0xa4   :  { %4318 = vmatprep.subr.mxu1 %v5184_v57  ;;  %4326 = vmatprep.mubr.f32.mxu1 %v5192_v61  ;;  %v5488_v15 = vsub.f32 %v119_v56, %v5473_v36 }
  0xa5   :  { %4319 = vmatpush3.msra.mxu1 %v5184_v57  ;;  %4333 = vmatprep.mubr.f32.mxu0 %v889_v16  ;;  %v5502_v16 = vsub.f32 %v118_v18, %v5482_v63 }
  0xa6   :  { %4320 = vmatprep.subr.mxu1 %v5207_v8 }
  0xa7   :  { %4321 = vmatpush3.msra.mxu1 %v5207_v8  ;;  %v5528_v22 = vand.u32 4294901760, %v5502_v16 }
  0xa8   :  { %4322 = vmatprep.subr.mxu1 %v5222_v31 }
  0xa9   :  { %4323 = vmatpush3.msra.mxu1 %v5222_v31  ;;  %6251 = vst [vmem:[#allocation17_spill] sm:$0xff] %v5528_v22 }
  0xaa   :  { %4324 = vmatprep.subr.mxu1 %v5234_v38 }
  0xab   :  { %4325 = vmatpush3.msra.mxu1 %v5234_v38 }
  0xac   :  { %4327 = vmatmul.mubr.f32.vlgmr.msra.gmra.mxu1 %v5195_v62  ;;  %v898_v62 = vsub.f32 %v5444_v33, %v897_v47 }
  0xad   :  { %4340 = vmatprep.mubr.f32.mxu1 %v5430_v5 }
  0xae   :  { %v899_v31 = vand.u32 4294901760, %v898_v62 }
 0x120   :  { %v4153_v17 = vpop.f32.mrf.mxu0 }
 0x122   :  { %v214_v20 = vpop.f32.mrf.mxu0 }
 0x128   :  { %v4188_v21 = vpop.f32.mrf.mxu1 }
 0x129   :  { %v382_v29 = vadd.f32 %v4188_v21, %v4153_v17  ;;  %v5504_v17 = vand.u32 4294901760, %v116_v0  ;;  %v1439_v21 = vsub.f32 %v5480_v54, %v5499_v11 }
 0x12a   :  { %v375_v26 = vpop.f32.mrf.mxu1 }
 0x12b   :  { %v376_v39 = vadd.f32 %v375_v26, %v214_v20  ;;  %v5523_v20 = vand.u32 4294901760, %v1425_v4 }
 0x12d   :  { %6250 = vst [vmem:[#allocation16_spill] sm:$0xff] %v5523_v20 }
 0x141   :  { %v4223_v23 = vpop.f32.mrf.mxu0 }
 0x142   :  { %v493_v42 = vadd.f32 %v4223_v23, %v382_v29  ;;  %v5531_v23 = vsub.f32 %v116_v0, %v5504_v17  ;;  %v1453_v29 = vsub.f32 %v5502_v16, %v5528_v22 }
 0x143   :  { %v485_v27 = vpop.f32.mrf.mxu0 }
 0x144   :  { %v486_v45 = vadd.f32 %v485_v27, %v376_v39  ;;  %v5566_v39 = vand.u32 4294901760, %v1453_v29 }
 0x146   :  { %6257 = vst [vmem:[#allocation23_spill] sm:$0xff] %v5566_v39 }
 0x14a   :  { %v4258_v28 = vpop.f32.mrf.mxu1 }
 0x14b   :  { %v590_v46 = vadd.f32 %v4258_v28, %v493_v42  ;;  %v5542_v28 = vand.u32 4294901760, %v5516_v19 }
 0x14c   :  { %v581_v43 = vpop.f32.mrf.mxu1 }
 0x14d   :  { %v582_v53 = vadd.f32 %v581_v43, %v486_v45  ;;  %6253 = vst [vmem:[#allocation19_spill] sm:$0xff] %v5542_v28 }
 0x163   :  { %v4293_v34 = vpop.f32.mrf.mxu0 }
 0x164   :  { %v715_v57 = vadd.f32 %v4293_v34, %v590_v46  ;;  %v115_v46 = vld [vmem:[#allocation7 + $0x40] sm:$0xff] }
 0x165   :  { %v708_v52 = vpop.f32.mrf.mxu0 }
 0x166   :  { %v709_v60 = vadd.f32 %v708_v52, %v582_v53  ;;  %v114_v52 = vld [vmem:[#allocation7 + $0x38] sm:$0xff] }
 0x16c   :  { %v4328_v58 = vpop.f32.mrf.mxu1 }
 0x16d   :  { %v808_v61 = vadd.f32 %v4328_v58, %v715_v57  ;;  %v5596_v57 = vand.u32 4294901760, %v114_v52  ;;  %v113_v58 = vld [vmem:[#allocation7 + $0x30] sm:$0xff] }
 0x16e   :  { %v801_v1 = vpop.f32.mrf.mxu1  ;;  %v5606_v62 = vand.u32 4294901760, %v113_v58 }
 0x16f   :  { %v5450_v6 = vand.u32 4294901760, %v808_v61  ;;  %v802_v8 = vadd.f32 %v801_v1, %v709_v60  ;;  %v112_v1 = vld [vmem:[#allocation7 + $0x28] sm:$0xff] }
 0x170   :  { %v5616_v13 = vsub.f32 %v113_v58, %v5606_v62  ;;  %v107_v58 = vld [vmem:[#allocation7] sm:$0xff] }
 0x171   :  { %v935_v25 = vsub.f32 %v808_v61, %v5450_v6  ;;  %v5453_v30 = vand.u32 4294901760, %v802_v8  ;;  %4329 = vmatprep.subr.mxu0 %v5450_v6  ;;  %v5604_v61 = vsub.f32 %v114_v52, %v5596_v57 }
 0x172   :  { %4330 = vmatpush3.msra.mxu0 %v5450_v6 }
 0x173   :  { %v942_v38 = vsub.f32 %v802_v8, %v5453_v30  ;;  %4331 = vmatprep.subr.mxu0 %v5453_v30  ;;  %v936_v40 = vand.u32 4294901760, %v935_v25  ;;  %v5613_v8 = vand.u32 4294901760, %v5604_v61 }
 0x174   :  { %4332 = vmatpush3.msra.mxu0 %v5453_v30 }
 0x175   :  { %4343 = vmatprep.subr.mxu0 %v935_v25  ;;  %4334 = vmatmul.mubr.f32.vlgmr.msra.gmra.mxu0 %v899_v31  ;;  %v937_v50 = vsub.f32 %v935_v25, %v936_v40  ;;  %v943_v51 = vand.u32 4294901760, %v942_v38  ;;  %6261 = vst [vmem:[#allocation27_spill] sm:$0xff] %v5613_v8  ;;  %v1481_v32 = vsub.f32 %v5604_v61, %v5613_v8 }
 0x176   :  { %4344 = vmatpush3.msra.mxu0 %v935_v25  ;;  %4347 = vmatprep.mubr.f32.mxu0 %v5433_v9  ;;  %v1432_v9 = vsub.f32 %v5471_v35, %v5485_v14  ;;  %v5618_v25 = vand.u32 4294901760, %v112_v1 }
 0x177   :  { %4345 = vmatprep.subr.mxu0 %v942_v38  ;;  %v938_v7 = vand.u32 4294901760, %v937_v50  ;;  %v944_v12 = vsub.f32 %v942_v38, %v943_v51  ;;  %v110_v50 = vld [vmem:[#allocation7 + $0x18] sm:$0xff] }
 0x178   :  { %4346 = vmatpush3.msra.mxu0 %v942_v38  ;;  %v5536_v26 = vand.u32 4294901760, %v1432_v9  ;;  %v5627_v38 = vand.u32 4294901760, %v5616_v13 }
 0x179   :  { %4336 = vmatprep.subr.mxu1 %v938_v7  ;;  %4357 = vmatprep.subr.mxu0 %v936_v40  ;;  %v945_v41 = vand.u32 4294901760, %v944_v12  ;;  %v5644_v12 = vand.u32 4294901760, %v110_v50 }
 0x17a   :  { %4337 = vmatpush3.msra.mxu1 %v938_v7  ;;  %4348 = vmatmul.mubr.f32.vlgmr.msra.gmra.mxu0 %v5444_v33  ;;  %6252 = vst [vmem:[#allocation18_spill] sm:$0xff] %v5536_v26  ;;  %v5553_v33 = vand.u32 4294901760, %v5531_v23  ;;  %6263 = vst [vmem:[#allocation29_spill] sm:$0xff] %v5627_v38  ;;  %v1488_v56 = vsub.f32 %v5616_v13, %v5627_v38 }
 0x17b   :  { %4358 = vmatpush3.msra.mxu0 %v936_v40  ;;  %4338 = vmatprep.subr.mxu1 %v945_v41  ;;  %v5630_v40 = vsub.f32 %v112_v1, %v5618_v25  ;;  %v5657_v4 = vsub.f32 %v110_v50, %v5644_v12 }
 0x17c   :  { %4359 = vmatprep.subr.mxu0 %v943_v51  ;;  %4339 = vmatpush3.msra.mxu1 %v945_v41  ;;  %6255 = vst [vmem:[#allocation21_spill] sm:$0xff] %v5553_v33  ;;  %v1467_v42 = vsub.f32 %v5531_v23, %v5553_v33  ;;  %v109_v41 = vld [vmem:[#allocation7 + $0x10] sm:$0xff]  ;;  %v5652_v44 = vand.u32 4294901760, %v1488_v56 }
 0x17d   :  { %4360 = vmatpush3.msra.mxu0 %v943_v51  ;;  %4341 = vmatmul.mubr.f32.vlgmr.msra.gmra.mxu1 %v5441_v24  ;;  %v5637_v51 = vand.u32 4294901760, %v1481_v32  ;;  %v5642_v7 = vand.u32 4294901760, %v5630_v40  ;;  %v5659_v9 = vand.u32 4294901760, %v109_v41  ;;  %v5692_v32 = vand.u32 4294901760, %v107_v58 }
 0x17e   :  { %4350 = vmatprep.subr.mxu1 %v5450_v6  ;;  %4354 = vmatprep.mubr.f32.mxu1 %v887_v10  ;;  %v5513_v10 = vand.u32 4294901760, %v5488_v15  ;;  %v5580_v45 = vand.u32 4294901760, %v1467_v42  ;;  %6266 = vst [vmem:[#allocation32_spill] sm:$0xff] %v5652_v44 }
 0x17f   :  { %4351 = vmatpush3.msra.mxu1 %v5450_v6  ;;  %4361 = vmatprep.mubr.f32.mxu0 %v5430_v5  ;;  %6264 = vst [vmem:[#allocation30_spill] sm:$0xff] %v5637_v51  ;;  %6265 = vst [vmem:[#allocation31_spill] sm:$0xff] %v5642_v7  ;;  %v1495_v0 = vsub.f32 %v5630_v40, %v5642_v7  ;;  %v5674_v42 = vsub.f32 %v109_v41, %v5659_v9 }
 0x180   :  { %4352 = vmatprep.subr.mxu1 %v5453_v30  ;;  %4362 = vmatmul.mubr.f32.vlgmr.msra.gmra.mxu0 %v5441_v24  ;;  %v1446_v27 = vsub.f32 %v5488_v15, %v5513_v10  ;;  %6259 = vst [vmem:[#allocation25_spill] sm:$0xff] %v5580_v45 }
 0x181   :  { %4353 = vmatpush3.msra.mxu1 %v5453_v30  ;;  %4371 = vmatprep.subr.mxu0 %v5457_v37  ;;  %v5668_v29 = vand.u32 4294901760, %v1495_v0 }
 0x182   :  { %4355 = vmatmul.mubr.f32.vlgmr.msra.gmra.mxu1 %v897_v47  ;;  %4364 = vmatprep.subr.mxu1 %v5450_v6  ;;  %v5558_v34 = vand.u32 4294901760, %v1446_v27  ;;  %v5591_v47 = vand.u32 4294901760, %v115_v46  ;;  %v108_v27 = vld [vmem:[#allocation7 + $0x8] sm:$0xff] }
 0x183   :  { %4365 = vmatpush3.msra.mxu1 %v5450_v6  ;;  %4368 = vmatprep.mubr.f32.mxu1 %v5430_v5  ;;  %v5548_v5 = vand.u32 4294901760, %v1439_v21  ;;  %6268 = vst [vmem:[#allocation34_spill] sm:$0xff] %v5668_v29 }
 0x184   :  { %4366 = vmatprep.subr.mxu1 %v5453_v30  ;;  %4372 = vmatpush3.msra.mxu0 %v5457_v37  ;;  %6256 = vst [vmem:[#allocation22_spill] sm:$0xff] %v5558_v34  ;;  %v5594_v53 = vsub.f32 %v115_v46, %v5591_v47  ;;  %v5676_v46 = vand.u32 4294901760, %v108_v27 }
 0x185   :  { %4367 = vmatpush3.msra.mxu1 %v5453_v30  ;;  %4373 = vmatprep.subr.mxu0 %v5462_v49  ;;  %6254 = vst [vmem:[#allocation20_spill] sm:$0xff] %v5548_v5  ;;  %v111_v30 = vld [vmem:[#allocation7 + $0x20] sm:$0xff] }
 0x186   :  { %4369 = vmatmul.mubr.f32.vlgmr.msra.gmra.mxu1 %v5441_v24  ;;  %4406 = vmatprep.subr.mxu1 %v5523_v20  ;;  %v1460_v24 = vsub.f32 %v5516_v19, %v5542_v28  ;;  %v5601_v60 = vand.u32 4294901760, %v5594_v53  ;;  %v5633_v48 = vand.u32 4294901760, %v111_v30 }
 0x187   :  { %4407 = vmatpush3.msra.mxu1 %v5523_v20  ;;  %4374 = vmatpush3.msra.mxu0 %v5462_v49 }
 0x188   :  { %4408 = vmatprep.subr.mxu1 %v5536_v26  ;;  %4375 = vmatprep.subr.mxu0 %v5468_v2  ;;  %v5574_v43 = vand.u32 4294901760, %v1460_v24  ;;  %6260 = vst [vmem:[#allocation26_spill] sm:$0xff] %v5601_v60  ;;  %v1474_v6 = vsub.f32 %v5594_v53, %v5601_v60  ;;  %v5648_v18 = vsub.f32 %v111_v30, %v5633_v48  ;;  %v5671_v24 = vand.u32 4294901760, %v5657_v4 }
 0x189   :  { %4409 = vmatpush3.msra.mxu1 %v5536_v26  ;;  %4376 = vmatpush3.msra.mxu0 %v5468_v2  ;;  %v5690_v30 = vsub.f32 %v108_v27, %v5676_v46  ;;  %v5707_v27 = vsub.f32 %v107_v58, %v5692_v32 }
 0x18a   :  { %4410 = vmatprep.subr.mxu1 %v5548_v5  ;;  %4377 = vmatprep.subr.mxu0 %v5473_v36  ;;  %6258 = vst [vmem:[#allocation24_spill] sm:$0xff] %v5574_v43  ;;  %v5622_v31 = vand.u32 4294901760, %v1474_v6  ;;  %v5664_v21 = vand.u32 4294901760, %v5648_v18  ;;  %6269 = vst [vmem:[#allocation35_spill] sm:$0xff] %v5671_v24  ;;  %v1509_v1 = vsub.f32 %v5657_v4, %v5671_v24  ;;  %v5687_v6 = vand.u32 4294901760, %v5674_v42 }
 0x18b   :  { %4411 = vmatpush3.msra.mxu1 %v5548_v5  ;;  %4378 = vmatpush3.msra.mxu0 %v5473_v36  ;;  %v5704_v0 = vand.u32 4294901760, %v5690_v30 }
 0x18c   :  { %4412 = vmatprep.subr.mxu1 %v5558_v34  ;;  %4379 = vmatprep.subr.mxu0 %v5482_v63  ;;  %6262 = vst [vmem:[#allocation28_spill] sm:$0xff] %v5622_v31  ;;  %6267 = vst [vmem:[#allocation33_spill] sm:$0xff] %v5664_v21  ;;  %v1502_v52 = vsub.f32 %v5648_v18, %v5664_v21  ;;  %v5699_v56 = vand.u32 4294901760, %v1509_v1  ;;  %v1516_v41 = vsub.f32 %v5674_v42, %v5687_v6 }
 0x18d   :  { %4413 = vmatpush3.msra.mxu1 %v5558_v34  ;;  %4380 = vmatpush3.msra.mxu0 %v5482_v63  ;;  %6270 = vst [vmem:[#allocation36_spill] sm:$0xff] %v5687_v6  ;;  %6273 = vst [vmem:[#allocation39_spill] sm:$0xff] %v5704_v0  ;;  %v1523_v1 = vsub.f32 %v5690_v30, %v5704_v0 }
 0x18e   :  { %4414 = vmatprep.subr.mxu1 %v5566_v39  ;;  %4381 = vmatprep.subr.mxu0 %v5490_v3  ;;  %v5696_v50 = vand.u32 4294901760, %v1502_v52  ;;  %6272 = vst [vmem:[#allocation38_spill] sm:$0xff] %v5699_v56  ;;  %v5713_v52 = vand.u32 4294901760, %v1516_v41 }
 0x18f   :  { %4415 = vmatpush3.msra.mxu1 %v5566_v39  ;;  %4382 = vmatpush3.msra.mxu0 %v5490_v3  ;;  %v5724_v58 = vand.u32 4294901760, %v1523_v1 }
 0x190   :  { %4416 = vmatprep.subr.mxu1 %v5574_v43  ;;  %4383 = vmatprep.subr.mxu0 %v5504_v17  ;;  %6271 = vst [vmem:[#allocation37_spill] sm:$0xff] %v5696_v50  ;;  %6274 = vst [vmem:[#allocation40_spill] sm:$0xff] %v5713_v52 }
 0x191   :  { %4417 = vmatpush3.msra.mxu1 %v5574_v43  ;;  %4384 = vmatpush3.msra.mxu0 %v5504_v17  ;;  %6276 = vst [vmem:[#allocation42_spill] sm:$0xff] %v5724_v58 }
 0x192   :  { %4418 = vmatprep.subr.mxu1 %v5580_v45  ;;  %4385 = vmatprep.subr.mxu0 %v5591_v47 }
 0x193   :  { %4419 = vmatpush3.msra.mxu1 %v5580_v45  ;;  %4386 = vmatpush3.msra.mxu0 %v5591_v47 }
 0x194   :  { %4387 = vmatprep.subr.mxu0 %v5596_v57  ;;  %4420 = vmatprep.subr.mxu1 %v5622_v31 }
 0x195   :  { %4388 = vmatpush3.msra.mxu0 %v5596_v57  ;;  %4421 = vmatpush3.msra.mxu1 %v5622_v31 }
 0x196   :  { %4389 = vmatprep.subr.mxu0 %v5606_v62  ;;  %4422 = vmatprep.subr.mxu1 %v5637_v51 }
 0x197   :  { %4390 = vmatpush3.msra.mxu0 %v5606_v62  ;;  %4423 = vmatpush3.msra.mxu1 %v5637_v51 }
 0x198   :  { %4391 = vmatprep.subr.mxu0 %v5618_v25  ;;  %4424 = vmatprep.subr.mxu1 %v5652_v44 }
 0x199   :  { %4392 = vmatpush3.msra.mxu0 %v5618_v25  ;;  %4425 = vmatpush3.msra.mxu1 %v5652_v44 }
 0x19a   :  { %4393 = vmatprep.subr.mxu0 %v5633_v48  ;;  %4426 = vmatprep.subr.mxu1 %v5668_v29 }
 0x19b   :  { %4394 = vmatpush3.msra.mxu0 %v5633_v48  ;;  %4427 = vmatpush3.msra.mxu1 %v5668_v29  ;;  %v5718_v29 = vand.u32 4294901760, %v5707_v27 }
 0x19c   :  { %4395 = vmatprep.subr.mxu0 %v5644_v12  ;;  %4428 = vmatprep.subr.mxu1 %v5696_v50 }
 0x19d   :  { %4396 = vmatpush3.msra.mxu0 %v5644_v12  ;;  %4429 = vmatpush3.msra.mxu1 %v5696_v50  ;;  %6275 = vst [vmem:[#allocation41_spill] sm:$0xff] %v5718_v29  ;;  %v1530_v41 = vsub.f32 %v5707_v27, %v5718_v29 }
 0x19e   :  { %4397 = vmatprep.subr.mxu0 %v5659_v9  ;;  %4430 = vmatprep.subr.mxu1 %v5699_v56 }
 0x19f   :  { %4398 = vmatpush3.msra.mxu0 %v5659_v9  ;;  %4431 = vmatpush3.msra.mxu1 %v5699_v56  ;;  %v5730_v50 = vand.u32 4294901760, %v1530_v41 }
 0x1a0   :  { %4399 = vmatprep.subr.mxu0 %v5676_v46  ;;  %4432 = vmatprep.subr.mxu1 %v5713_v52 }
 0x1a1   :  { %4400 = vmatpush3.msra.mxu0 %v5676_v46  ;;  %4433 = vmatpush3.msra.mxu1 %v5713_v52  ;;  %6277 = vst [vmem:[#allocation43_spill] sm:$0xff] %v5730_v50 }
 0x1a2   :  { %4401 = vmatprep.subr.mxu0 %v5692_v32  ;;  %4434 = vmatprep.subr.mxu1 %v5724_v58 }
 0x1a3   :  { %4402 = vmatpush3.msra.mxu0 %v5692_v32  ;;  %4435 = vmatpush3.msra.mxu1 %v5724_v58 }
 0x1a4   :  { %4441 = vmatprep.subr.mxu0 %v5466_v59  ;;  %4436 = vmatprep.subr.mxu1 %v5730_v50 }
 0x1a5   :  { %4437 = vmatpush3.msra.mxu1 %v5730_v50 }
 0x1a6   :  { %4476 = vmatprep.subr.mxu1 %v5457_v37 }
 0x235   :  { %v4335_v1 = vpop.f32.mrf.mxu0 }
 0x237   :  { %v891_v56 = vpop.f32.mrf.mxu0 }
 0x23a   :  { %v4349_v44 = vpop.f32.mrf.mxu0 }
 0x23c   :  { %v1064_v45 = vpop.f32.mrf.mxu0 }
 0x23d   :  { %v4342_v51 = vpop.f32.mrf.mxu1 }
 0x23e   :  { %v989_v31 = vadd.f32 %v4342_v51, %v4335_v1 }
 0x23f   :  { %v982_v43 = vpop.f32.mrf.mxu1 }
 0x240   :  { %v1072_v52 = vadd.f32 %v4349_v44, %v989_v31  ;;  %v983_v41 = vadd.f32 %v982_v43, %v891_v56  ;;  %v4363_v5 = vpop.f32.mrf.mxu0  ;;  %v6282_v56 = vld [vmem:[#allocation39_spill] sm:$0xff] }
 0x242   :  { %v1065_v39 = vadd.f32 %v1064_v45, %v983_v41  ;;  %v4356_v34 = vpop.f32.mrf.mxu1  ;;  %v1231_v0 = vpop.f32.mrf.mxu0 }
 0x243   :  { %v1155_v26 = vadd.f32 %v4356_v34, %v1072_v52  ;;  %v125_v52 = vld [vmem:[#allocation10] sm:$0xff] }
 0x244   :  { %v1146_v58 = vpop.f32.mrf.mxu1 }
 0x245   :  { %v1238_v20 = vadd.f32 %v4363_v5, %v1155_v26  ;;  %v1147_v29 = vadd.f32 %v1146_v58, %v1065_v39  ;;  %v2007_v58 = vsel %vm811_vm0, %v125_v52, 0 }
 0x246   :  { %v4370_v50 = vpop.f32.mrf.mxu1  ;;  %v5893_v1 = vand.u32 4294901760, %v2007_v58 }
 0x247   :  { %v1232_v6 = vadd.f32 %v1231_v0, %v1147_v29  ;;  %v5737_v24 = vadd.f32 %v4370_v50, %v1238_v20  ;;  %v6279_v29 = vld [vmem:[#allocation33_spill] sm:$0xff]  ;;  %v6281_v50 = vld [vmem:[#allocation36_spill] sm:$0xff] }
 0x248   :  { %v1310_v21 = vpop.f32.mrf.mxu1  ;;  %v6283_v0 = vld [vmem:[#allocation41_spill] sm:$0xff]  ;;  %v5896_v41 = vsub.f32 %v2007_v58, %v5893_v1 }
 0x249   :  { %v5740_v7 = vand.u32 4294901760, %v5737_v24  ;;  %v5742_v51 = vadd.f32 %v1310_v21, %v1232_v6  ;;  %v6278_v21 = vld [vmem:[#allocation31_spill] sm:$0xff] }
 0x24a   :  { %v6280_v6 = vld [vmem:[#allocation35_spill] sm:$0xff] }
 0x24b   :  { %v5746_v43 = vsub.f32 %v5737_v24, %v5740_v7  ;;  %v5749_v34 = vand.u32 4294901760, %v5742_v51 }
 0x24d   :  { %v1413_v26 = vand.u32 4294901760, %v5746_v43  ;;  %v1402_v5 = vsub.f32 %v5742_v51, %v5749_v34  ;;  %4438 = vmatprep.mubr.f32.mxu1 %v5749_v34 }
 0x24e   :  { %4439 = vmatmul.mubr.f32.vlgmr.msra.gmra.mxu1 %v5740_v7 }
 0x24f   :  { %4477 = vmatpush3.msra.mxu1 %v5457_v37  ;;  %v1403_v20 = vand.u32 4294901760, %v1402_v5  ;;  %v1414_v39 = vsub.f32 %v5746_v43, %v1413_v26 }
 0x250   :  { %4478 = vmatprep.subr.mxu1 %v5462_v49 }
 0x251   :  { %4479 = vmatpush3.msra.mxu1 %v5462_v49  ;;  %4508 = vmatprep.mubr.f32.mxu1 %v1403_v20  ;;  %v1404_v45 = vsub.f32 %v1402_v5, %v1403_v20  ;;  %v1415_v44 = vand.u32 4294901760, %v1414_v39 }
 0x252   :  { %4480 = vmatprep.subr.mxu1 %v5468_v2 }
 0x253   :  { %4481 = vmatpush3.msra.mxu1 %v5468_v2  ;;  %v1405_v31 = vand.u32 4294901760, %v1404_v45 }
 0x254   :  { %4482 = vmatprep.subr.mxu1 %v5473_v36 }
 0x255   :  { %4483 = vmatpush3.msra.mxu1 %v5473_v36  ;;  %4403 = vmatprep.mubr.f32.mxu0 %v1405_v31 }
 0x256   :  { %4484 = vmatprep.subr.mxu1 %v5482_v63  ;;  %4404 = vmatmul.mubr.f32.vlgmr.msra.gmra.mxu0 %v1415_v44 }
 0x257   :  { %4442 = vmatpush3.msra.mxu0 %v5466_v59  ;;  %4485 = vmatpush3.msra.mxu1 %v5482_v63 }
 0x258   :  { %4443 = vmatprep.subr.mxu0 %v5471_v35  ;;  %4473 = vmatprep.mubr.f32.mxu0 %v1402_v5  ;;  %v126_v5 = vld [vmem:[#allocation10 + $0x8] sm:$0xff] }
 0x259   :  { %4486 = vmatprep.subr.mxu1 %v5490_v3  ;;  %4444 = vmatpush3.msra.mxu0 %v5471_v35  ;;  %v2010_v45 = vsel %vm811_vm0, %v126_v5, 0 }
 0x25a   :  { %4487 = vmatpush3.msra.mxu1 %v5490_v3  ;;  %4445 = vmatprep.subr.mxu0 %v5480_v54  ;;  %v5908_v44 = vand.u32 4294901760, %v2010_v45 }
 0x25b   :  { %4488 = vmatprep.subr.mxu1 %v5504_v17  ;;  %4446 = vmatpush3.msra.mxu0 %v5480_v54 }
 0x25c   :  { %4489 = vmatpush3.msra.mxu1 %v5504_v17  ;;  %4447 = vmatprep.subr.mxu0 %v5488_v15  ;;  %6286 = vst [vmem:[#allocation46_spill] sm:$0xff] %v5908_v44 }
 0x25d   :  { %4490 = vmatprep.subr.mxu1 %v5591_v47  ;;  %4448 = vmatpush3.msra.mxu0 %v5488_v15 }
 0x25e   :  { %4491 = vmatpush3.msra.mxu1 %v5591_v47  ;;  %4449 = vmatprep.subr.mxu0 %v5502_v16 }
 0x25f   :  { %4492 = vmatprep.subr.mxu1 %v5596_v57  ;;  %4450 = vmatpush3.msra.mxu0 %v5502_v16 }
 0x260   :  { %4493 = vmatpush3.msra.mxu1 %v5596_v57  ;;  %4451 = vmatprep.subr.mxu0 %v5516_v19 }
 0x261   :  { %4494 = vmatprep.subr.mxu1 %v5606_v62  ;;  %4452 = vmatpush3.msra.mxu0 %v5516_v19 }
 0x262   :  { %4495 = vmatpush3.msra.mxu1 %v5606_v62  ;;  %4453 = vmatprep.subr.mxu0 %v5531_v23 }
 0x263   :  { %4496 = vmatprep.subr.mxu1 %v5618_v25  ;;  %4454 = vmatpush3.msra.mxu0 %v5531_v23 }
 0x264   :  { %4497 = vmatpush3.msra.mxu1 %v5618_v25  ;;  %4455 = vmatprep.subr.mxu0 %v5594_v53 }
 0x265   :  { %4498 = vmatprep.subr.mxu1 %v5633_v48  ;;  %4456 = vmatpush3.msra.mxu0 %v5594_v53 }
 0x266   :  { %4499 = vmatpush3.msra.mxu1 %v5633_v48  ;;  %4457 = vmatprep.subr.mxu0 %v5604_v61 }
 0x267   :  { %4500 = vmatprep.subr.mxu1 %v5644_v12  ;;  %4458 = vmatpush3.msra.mxu0 %v5604_v61 }
 0x268   :  { %4501 = vmatpush3.msra.mxu1 %v5644_v12  ;;  %4459 = vmatprep.subr.mxu0 %v5616_v13 }
 0x269   :  { %4502 = vmatprep.subr.mxu1 %v5659_v9  ;;  %4460 = vmatpush3.msra.mxu0 %v5616_v13 }
 0x26a   :  { %4503 = vmatpush3.msra.mxu1 %v5659_v9  ;;  %4461 = vmatprep.subr.mxu0 %v5630_v40 }
 0x26b   :  { %4504 = vmatprep.subr.mxu1 %v5676_v46  ;;  %4462 = vmatpush3.msra.mxu0 %v5630_v40 }
 0x26c   :  { %4505 = vmatpush3.msra.mxu1 %v5676_v46  ;;  %4463 = vmatprep.subr.mxu0 %v5648_v18 }
 0x26d   :  { %4506 = vmatprep.subr.mxu1 %v5692_v32  ;;  %4464 = vmatpush3.msra.mxu0 %v5648_v18 }
 0x26e   :  { %4507 = vmatpush3.msra.mxu1 %v5692_v32  ;;  %4465 = vmatprep.subr.mxu0 %v5657_v4 }
 0x26f   :  { %4509 = vmatmul.mubr.f32.vlgmr.msra.gmra.mxu1 %v1413_v26  ;;  %4546 = vmatprep.subr.mxu1 %v5457_v37 }
 0x270   :  { %4466 = vmatpush3.msra.mxu0 %v5657_v4  ;;  %4547 = vmatpush3.msra.mxu1 %v5457_v37 }
 0x271   :  { %4578 = vmatprep.mubr.f32.mxu1 %v5749_v34  ;;  %4467 = vmatprep.subr.mxu0 %v5674_v42 }
 0x272   :  { %4548 = vmatprep.subr.mxu1 %v5462_v49  ;;  %4468 = vmatpush3.msra.mxu0 %v5674_v42 }
 0x273   :  { %4549 = vmatpush3.msra.mxu1 %v5462_v49  ;;  %4469 = vmatprep.subr.mxu0 %v5690_v30 }
 0x274   :  { %4550 = vmatprep.subr.mxu1 %v5468_v2  ;;  %4470 = vmatpush3.msra.mxu0 %v5690_v30 }
 0x275   :  { %4551 = vmatpush3.msra.mxu1 %v5468_v2  ;;  %4471 = vmatprep.subr.mxu0 %v5707_v27 }
 0x276   :  { %4552 = vmatprep.subr.mxu1 %v5473_v36  ;;  %4472 = vmatpush3.msra.mxu0 %v5707_v27 }
 0x277   :  { %4553 = vmatpush3.msra.mxu1 %v5473_v36  ;;  %4474 = vmatmul.mubr.f32.vlgmr.msra.gmra.mxu0 %v5746_v43  ;;  %v5900_v43 = vand.u32 4294901760, %v5896_v41 }
 0x278   :  { %4511 = vmatprep.subr.mxu0 %v5477_v55  ;;  %4554 = vmatprep.subr.mxu1 %v5482_v63 }
 0x279   :  { %4512 = vmatpush3.msra.mxu0 %v5477_v55  ;;  %4543 = vmatprep.mubr.f32.mxu0 %v5749_v34  ;;  %6284 = vst [vmem:[#allocation44_spill] sm:$0xff] %v5900_v43  ;;  %v2082_v34 = vsub.f32 %v5896_v41, %v5900_v43 }
 0x27a   :  { %4555 = vmatpush3.msra.mxu1 %v5482_v63  ;;  %4513 = vmatprep.subr.mxu0 %v5485_v14 }
 0x27b   :  { %4556 = vmatprep.subr.mxu1 %v5490_v3  ;;  %4514 = vmatpush3.msra.mxu0 %v5485_v14  ;;  %v5904_v26 = vand.u32 4294901760, %v2082_v34  ;;  %v5911_v34 = vsub.f32 %v2010_v45, %v5908_v44 }
 0x27c   :  { %4557 = vmatpush3.msra.mxu1 %v5490_v3  ;;  %4515 = vmatprep.subr.mxu0 %v5499_v11 }
 0x27d   :  { %4558 = vmatprep.subr.mxu1 %v5504_v17  ;;  %4516 = vmatpush3.msra.mxu0 %v5499_v11  ;;  %6285 = vst [vmem:[#allocation45_spill] sm:$0xff] %v5904_v26 }
 0x27e   :  { %4559 = vmatpush3.msra.mxu1 %v5504_v17  ;;  %4517 = vmatprep.subr.mxu0 %v5513_v10 }
 0x27f   :  { %4560 = vmatprep.subr.mxu1 %v5591_v47  ;;  %4518 = vmatpush3.msra.mxu0 %v5513_v10 }
 0x280   :  { %4561 = vmatpush3.msra.mxu1 %v5591_v47  ;;  %4519 = vmatprep.subr.mxu0 %v5528_v22 }
 0x281   :  { %4562 = vmatprep.subr.mxu1 %v5596_v57  ;;  %4520 = vmatpush3.msra.mxu0 %v5528_v22 }
 0x282   :  { %4563 = vmatpush3.msra.mxu1 %v5596_v57  ;;  %4521 = vmatprep.subr.mxu0 %v5542_v28 }
 0x283   :  { %4564 = vmatprep.subr.mxu1 %v5606_v62  ;;  %4522 = vmatpush3.msra.mxu0 %v5542_v28 }
 0x284   :  { %4565 = vmatpush3.msra.mxu1 %v5606_v62  ;;  %4523 = vmatprep.subr.mxu0 %v5553_v33 }
 0x285   :  { %4566 = vmatprep.subr.mxu1 %v5618_v25  ;;  %4524 = vmatpush3.msra.mxu0 %v5553_v33 }
 0x286   :  { %4567 = vmatpush3.msra.mxu1 %v5618_v25  ;;  %4525 = vmatprep.subr.mxu0 %v5601_v60 }
 0x287   :  { %4568 = vmatprep.subr.mxu1 %v5633_v48  ;;  %4526 = vmatpush3.msra.mxu0 %v5601_v60 }
 0x288   :  { %4569 = vmatpush3.msra.mxu1 %v5633_v48  ;;  %4527 = vmatprep.subr.mxu0 %v5613_v8 }
 0x289   :  { %4570 = vmatprep.subr.mxu1 %v5644_v12  ;;  %4528 = vmatpush3.msra.mxu0 %v5613_v8 }
 0x28a   :  { %4571 = vmatpush3.msra.mxu1 %v5644_v12  ;;  %4529 = vmatprep.subr.mxu0 %v5627_v38 }
 0x28b   :  { %4572 = vmatprep.subr.mxu1 %v5659_v9  ;;  %4530 = vmatpush3.msra.mxu0 %v5627_v38  ;;  %v5914_v38 = vand.u32 4294901760, %v5911_v34 }
 0x28c   :  { %4573 = vmatpush3.msra.mxu1 %v5659_v9  ;;  %4531 = vmatprep.subr.mxu0 %v6278_v21 }
 0x28d   :  { %4574 = vmatprep.subr.mxu1 %v5676_v46  ;;  %4532 = vmatpush3.msra.mxu0 %v6278_v21  ;;  %6287 = vst [vmem:[#allocation47_spill] sm:$0xff] %v5914_v38 }
 0x28e   :  { %4575 = vmatpush3.msra.mxu1 %v5676_v46  ;;  %4533 = vmatprep.subr.mxu0 %v6279_v29 }
 0x28f   :  { %4576 = vmatprep.subr.mxu1 %v5692_v32  ;;  %4534 = vmatpush3.msra.mxu0 %v6279_v29 }
 0x290   :  { %4577 = vmatpush3.msra.mxu1 %v5692_v32  ;;  %4535 = vmatprep.subr.mxu0 %v6280_v6 }
 0x291   :  { %4579 = vmatmul.mubr.f32.vlgmr.msra.gmra.mxu1 %v5740_v7  ;;  %4536 = vmatpush3.msra.mxu0 %v6280_v6 }
 0x292   :  { %4537 = vmatprep.subr.mxu0 %v6281_v50  ;;  %4592 = vmatprep.mubr.f32.mxu1 %v5893_v1 }
 0x293   :  { %4538 = vmatpush3.msra.mxu0 %v6281_v50 }
 0x294   :  { %4539 = vmatprep.subr.mxu0 %v6282_v56 }
 0x295   :  { %4540 = vmatpush3.msra.mxu0 %v6282_v56 }
 0x296   :  { %4541 = vmatprep.subr.mxu0 %v6283_v0 }
 0x297   :  { %4542 = vmatpush3.msra.mxu0 %v6283_v0 }
 0x298   :  { %4544 = vmatmul.mubr.f32.vlgmr.msra.gmra.mxu0 %v5740_v7 }
 0x299   :  { %4585 = vmatprep.mubr.f32.mxu0 %v5904_v26 }
 0x30e   :  { %v4440_v20 = vpop.f32.mrf.mxu1 }
 0x310   :  { %v1568_v52 = vpop.f32.mrf.mxu1 }
 0x316   :  { %v4405_v7 = vpop.f32.mrf.mxu0 }
 0x317   :  { %v1575_v58 = vadd.f32 %v4440_v20, %v4405_v7  ;;  %v2092_v20 = vsub.f32 %v5911_v34, %v5914_v38 }
 0x318   :  { %v1407_v39 = vpop.f32.mrf.mxu0 }
 0x319   :  { %v1569_v50 = vadd.f32 %v1568_v52, %v1407_v39 }
 0x32f   :  { %v4510_v0 = vpop.f32.mrf.mxu1 }
 0x331   :  { %v1774_v26 = vpop.f32.mrf.mxu1 }
 0x337   :  { %v4475_v31 = vpop.f32.mrf.mxu0 }
 0x338   :  { %v1686_v6 = vadd.f32 %v4475_v31, %v1575_v58  ;;  %v6291_v58 = vld [vmem:[#allocation22_spill] sm:$0xff] }
 0x339   :  { %v1678_v56 = vpop.f32.mrf.mxu0 }
 0x33a   :  { %v1679_v29 = vadd.f32 %v1678_v56, %v1569_v50  ;;  %v1783_v21 = vadd.f32 %v4510_v0, %v1686_v6  ;;  %v5918_v6 = vand.u32 4294901760, %v2092_v20  ;;  %v6294_v20 = vld [vmem:[#allocation25_spill] sm:$0xff] }
 0x33c   :  { %v1775_v33 = vadd.f32 %v1774_v26, %v1679_v29  ;;  %v6289_v29 = vld [vmem:[#allocation18_spill] sm:$0xff]  ;;  %v6290_v26 = vld [vmem:[#allocation20_spill] sm:$0xff] }
 0x351   :  { %v4580_v8 = vpop.f32.mrf.mxu1 }
 0x353   :  { %v1994_v39 = vpop.f32.mrf.mxu1 }
 0x358   :  { %v4545_v5 = vpop.f32.mrf.mxu0 }
 0x359   :  { %v1908_v60 = vadd.f32 %v4545_v5, %v1783_v21  ;;  %v6288_v21 = vld [vmem:[#allocation16_spill] sm:$0xff]  ;;  %v6292_v5 = vld [vmem:[#allocation23_spill] sm:$0xff] }
 0x35a   :  { %v1901_v28 = vpop.f32.mrf.mxu0 }
 0x35b   :  { %v2001_v22 = vadd.f32 %v4580_v8, %v1908_v60  ;;  %v1902_v7 = vadd.f32 %v1901_v28, %v1775_v33 }
 0x35d   :  { %v2041_v31 = vand.u32 4294901760, %v2001_v22  ;;  %v1995_v45 = vadd.f32 %v1994_v39, %v1902_v7  ;;  %v6293_v7 = vld [vmem:[#allocation24_spill] sm:$0xff] }
 0x35e   :  { %v6295_v39 = vld [vmem:[#allocation28_spill] sm:$0xff] }
 0x35f   :  { %v2129_v52 = vsub.f32 %v2001_v22, %v2041_v31  ;;  %v2044_v50 = vand.u32 4294901760, %v1995_v45  ;;  %4581 = vmatprep.subr.mxu0 %v2041_v31 }
 0x360   :  { %4582 = vmatpush3.msra.mxu0 %v2041_v31 }
 0x361   :  { %v2136_v56 = vsub.f32 %v1995_v45, %v2044_v50  ;;  %4583 = vmatprep.subr.mxu0 %v2044_v50  ;;  %v2130_v0 = vand.u32 4294901760, %v2129_v52  ;;  %v6297_v45 = vld [vmem:[#allocation32_spill] sm:$0xff] }
 0x362   :  { %4584 = vmatpush3.msra.mxu0 %v2044_v50 }
 0x363   :  { %4586 = vmatmul.mubr.f32.vlgmr.msra.gmra.mxu0 %v5918_v6  ;;  %4595 = vmatprep.subr.mxu0 %v2129_v52  ;;  %v2131_v28 = vsub.f32 %v2129_v52, %v2130_v0  ;;  %v2137_v33 = vand.u32 4294901760, %v2136_v56 }
 0x364   :  { %4596 = vmatpush3.msra.mxu0 %v2129_v52  ;;  %4599 = vmatprep.mubr.f32.mxu0 %v5896_v41  ;;  %v6298_v52 = vld [vmem:[#allocation34_spill] sm:$0xff] }
 0x365   :  { %4597 = vmatprep.subr.mxu0 %v2136_v56  ;;  %v2132_v60 = vand.u32 4294901760, %v2131_v28  ;;  %v2138_v22 = vsub.f32 %v2136_v56, %v2137_v33  ;;  %v6302_v28 = vld [vmem:[#allocation42_spill] sm:$0xff] }
 0x366   :  { %4598 = vmatpush3.msra.mxu0 %v2136_v56  ;;  %v6300_v56 = vld [vmem:[#allocation38_spill] sm:$0xff] }
 0x367   :  { %4588 = vmatprep.subr.mxu1 %v2132_v60  ;;  %4609 = vmatprep.subr.mxu0 %v2130_v0  ;;  %v2139_v8 = vand.u32 4294901760, %v2138_v22 }
 0x368   :  { %4589 = vmatpush3.msra.mxu1 %v2132_v60  ;;  %4600 = vmatmul.mubr.f32.vlgmr.msra.gmra.mxu0 %v5911_v34 }
 0x369   :  { %4610 = vmatpush3.msra.mxu0 %v2130_v0  ;;  %4590 = vmatprep.subr.mxu1 %v2139_v8  ;;  %v6301_v0 = vld [vmem:[#allocation40_spill] sm:$0xff] }
 0x36a   :  { %4611 = vmatprep.subr.mxu0 %v2137_v33  ;;  %4591 = vmatpush3.msra.mxu1 %v2139_v8  ;;  %v2005_v8 = vmul.f32 -0.50113636, %v5737_v24 }
 0x36b   :  { %4612 = vmatpush3.msra.mxu0 %v2137_v33  ;;  %4593 = vmatmul.mubr.f32.vlgmr.msra.gmra.mxu1 %v5908_v44  ;;  %v6303_v33 = vld [vmem:[#allocation43_spill] sm:$0xff] }
 0x36c   :  { %4602 = vmatprep.subr.mxu1 %v2041_v31  ;;  %4606 = vmatprep.mubr.f32.mxu1 %v5900_v43 }
 0x36d   :  { %4603 = vmatpush3.msra.mxu1 %v2041_v31  ;;  %4613 = vmatprep.mubr.f32.mxu0 %v5893_v1 }
 0x36e   :  { %4604 = vmatprep.subr.mxu1 %v2044_v50  ;;  %4614 = vmatmul.mubr.f32.vlgmr.msra.gmra.mxu0 %v5908_v44 }
 0x36f   :  { %4605 = vmatpush3.msra.mxu1 %v2044_v50  ;;  %4623 = vmatprep.subr.mxu0 %v5457_v37 }
 0x370   :  { %4607 = vmatmul.mubr.f32.vlgmr.msra.gmra.mxu1 %v5914_v38  ;;  %4616 = vmatprep.subr.mxu1 %v2041_v31 }
 0x371   :  { %4617 = vmatpush3.msra.mxu1 %v2041_v31  ;;  %4620 = vmatprep.mubr.f32.mxu1 %v5893_v1  ;;  %v6296_v31 = vld [vmem:[#allocation30_spill] sm:$0xff] }
 0x372   :  { %4618 = vmatprep.subr.mxu1 %v2044_v50  ;;  %4624 = vmatpush3.msra.mxu0 %v5457_v37 }
 0x373   :  { %4619 = vmatpush3.msra.mxu1 %v2044_v50  ;;  %4625 = vmatprep.subr.mxu0 %v5462_v49  ;;  %v6299_v50 = vld [vmem:[#allocation37_spill] sm:$0xff] }
 0x374   :  { %4621 = vmatmul.mubr.f32.vlgmr.msra.gmra.mxu1 %v5908_v44  ;;  %4658 = vmatprep.subr.mxu1 %v6288_v21 }
 0x375   :  { %4659 = vmatpush3.msra.mxu1 %v6288_v21  ;;  %4626 = vmatpush3.msra.mxu0 %v5462_v49 }
 0x376   :  { %4660 = vmatprep.subr.mxu1 %v6289_v29  ;;  %4627 = vmatprep.subr.mxu0 %v5468_v2 }
 0x377   :  { %4661 = vmatpush3.msra.mxu1 %v6289_v29  ;;  %4628 = vmatpush3.msra.mxu0 %v5468_v2 }
 0x378   :  { %4662 = vmatprep.subr.mxu1 %v6290_v26  ;;  %4629 = vmatprep.subr.mxu0 %v5473_v36 }
 0x379   :  { %4663 = vmatpush3.msra.mxu1 %v6290_v26  ;;  %4630 = vmatpush3.msra.mxu0 %v5473_v36  ;;  %v2004_v26 = vmul.f32 -0.50113636, %v5742_v51 }
 0x37a   :  { %4664 = vmatprep.subr.mxu1 %v6291_v58  ;;  %4631 = vmatprep.subr.mxu0 %v5482_v63 }
 0x37b   :  { %4665 = vmatpush3.msra.mxu1 %v6291_v58  ;;  %4632 = vmatpush3.msra.mxu0 %v5482_v63 }
 0x37c   :  { %4666 = vmatprep.subr.mxu1 %v6292_v5  ;;  %4633 = vmatprep.subr.mxu0 %v5490_v3 }
 0x37d   :  { %4667 = vmatpush3.msra.mxu1 %v6292_v5  ;;  %4634 = vmatpush3.msra.mxu0 %v5490_v3 }
 0x37e   :  { %4668 = vmatprep.subr.mxu1 %v6293_v7  ;;  %4635 = vmatprep.subr.mxu0 %v5504_v17 }
 0x37f   :  { %4669 = vmatpush3.msra.mxu1 %v6293_v7  ;;  %4636 = vmatpush3.msra.mxu0 %v5504_v17 }
 0x380   :  { %4670 = vmatprep.subr.mxu1 %v6294_v20  ;;  %4637 = vmatprep.subr.mxu0 %v5591_v47 }
 0x381   :  { %4671 = vmatpush3.msra.mxu1 %v6294_v20  ;;  %4638 = vmatpush3.msra.mxu0 %v5591_v47 }
 0x382   :  { %4672 = vmatprep.subr.mxu1 %v6295_v39  ;;  %4639 = vmatprep.subr.mxu0 %v5596_v57 }
 0x383   :  { %4673 = vmatpush3.msra.mxu1 %v6295_v39  ;;  %4640 = vmatpush3.msra.mxu0 %v5596_v57 }
 0x384   :  { %4674 = vmatprep.subr.mxu1 %v6296_v31  ;;  %4641 = vmatprep.subr.mxu0 %v5606_v62 }
 0x385   :  { %4675 = vmatpush3.msra.mxu1 %v6296_v31  ;;  %4642 = vmatpush3.msra.mxu0 %v5606_v62 }
 0x386   :  { %4676 = vmatprep.subr.mxu1 %v6297_v45  ;;  %4643 = vmatprep.subr.mxu0 %v5618_v25 }
 0x387   :  { %4677 = vmatpush3.msra.mxu1 %v6297_v45  ;;  %4644 = vmatpush3.msra.mxu0 %v5618_v25 }
 0x388   :  { %4678 = vmatprep.subr.mxu1 %v6298_v52  ;;  %4645 = vmatprep.subr.mxu0 %v5633_v48 }
 0x389   :  { %4679 = vmatpush3.msra.mxu1 %v6298_v52  ;;  %4646 = vmatpush3.msra.mxu0 %v5633_v48 }
 0x38a   :  { %4680 = vmatprep.subr.mxu1 %v6299_v50  ;;  %4647 = vmatprep.subr.mxu0 %v5644_v12 }
 0x38b   :  { %4681 = vmatpush3.msra.mxu1 %v6299_v50  ;;  %4648 = vmatpush3.msra.mxu0 %v5644_v12 }
 0x38c   :  { %4682 = vmatprep.subr.mxu1 %v6300_v56  ;;  %4649 = vmatprep.subr.mxu0 %v5659_v9 }
 0x38d   :  { %4683 = vmatpush3.msra.mxu1 %v6300_v56  ;;  %4650 = vmatpush3.msra.mxu0 %v5659_v9 }
 0x38e   :  { %4684 = vmatprep.subr.mxu1 %v6301_v0  ;;  %4651 = vmatprep.subr.mxu0 %v5676_v46 }
 0x38f   :  { %4685 = vmatpush3.msra.mxu1 %v6301_v0  ;;  %4652 = vmatpush3.msra.mxu0 %v5676_v46 }
 0x390   :  { %4686 = vmatprep.subr.mxu1 %v6302_v28  ;;  %4653 = vmatprep.subr.mxu0 %v5692_v32 }
 0x391   :  { %4687 = vmatpush3.msra.mxu1 %v6302_v28  ;;  %4654 = vmatpush3.msra.mxu0 %v5692_v32 }
 0x392   :  { %4688 = vmatprep.subr.mxu1 %v6303_v33  ;;  %4693 = vmatprep.subr.mxu0 %v5466_v59 }
 0x393   :  { %4689 = vmatpush3.msra.mxu1 %v6303_v33 }
 0x394   :  { %4728 = vmatprep.subr.mxu1 %v5457_v37 }
 0x423   :  { %v4587_v60 = vpop.f32.mrf.mxu0 }
 0x424   :  { %v2096_v29 = vadd.f32 %v4587_v60, %v2005_v8 }
 0x425   :  { %v2085_v22 = vpop.f32.mrf.mxu0 }
 0x426   :  { %v2086_v5 = vadd.f32 %v2085_v22, %v2004_v26 }
 0x428   :  { %v4601_v21 = vpop.f32.mrf.mxu0 }
 0x42a   :  { %v2258_v20 = vpop.f32.mrf.mxu0 }
 0x42b   :  { %v4594_v58 = vpop.f32.mrf.mxu1 }
 0x42c   :  { %v2183_v7 = vadd.f32 %v4594_v58, %v2096_v29 }
 0x42d   :  { %v2176_v39 = vpop.f32.mrf.mxu1 }
 0x42e   :  { %v2266_v31 = vadd.f32 %v4601_v21, %v2183_v7  ;;  %v2177_v45 = vadd.f32 %v2176_v39, %v2086_v5  ;;  %v4615_v56 = vpop.f32.mrf.mxu0 }
 0x430   :  { %v2259_v52 = vadd.f32 %v2258_v20, %v2177_v45  ;;  %v4608_v50 = vpop.f32.mrf.mxu1  ;;  %v2425_v43 = vpop.f32.mrf.mxu0 }
 0x431   :  { %v2349_v0 = vadd.f32 %v4608_v50, %v2266_v31 }
 0x432   :  { %v2340_v28 = vpop.f32.mrf.mxu1 }
 0x433   :  { %v2432_v33 = vadd.f32 %v4615_v56, %v2349_v0  ;;  %v2341_v38 = vadd.f32 %v2340_v28, %v2259_v52 }
 0x434   :  { %v4622_v24 = vpop.f32.mrf.mxu1 }
 0x435   :  { %v2426_v44 = vadd.f32 %v2425_v43, %v2341_v38  ;;  %v5998_v60 = vadd.f32 %v4622_v24, %v2432_v33  ;;  %v6318_v33 = vld [vmem:[#allocation44_spill] sm:$0xff] }
 0x436   :  { %v2504_v51 = vpop.f32.mrf.mxu1 }
 0x437   :  { %v6001_v22 = vand.u32 4294901760, %v5998_v60  ;;  %v6003_v8 = vadd.f32 %v2504_v51, %v2426_v44  ;;  %v3199_v51 = vmul.f32 -0.50113636, %v5998_v60 }
 0x439   :  { %v6007_v21 = vsub.f32 %v5998_v60, %v6001_v22  ;;  %v6010_v29 = vand.u32 4294901760, %v6003_v8 }
 0x43b   :  { %v2607_v26 = vand.u32 4294901760, %v6007_v21  ;;  %v2596_v38 = vsub.f32 %v6003_v8, %v6010_v29  ;;  %4690 = vmatprep.mubr.f32.mxu1 %v6010_v29 }
 0x43c   :  { %4691 = vmatmul.mubr.f32.vlgmr.msra.gmra.mxu1 %v6001_v22 }
 0x43d   :  { %4729 = vmatpush3.msra.mxu1 %v5457_v37  ;;  %v2597_v43 = vand.u32 4294901760, %v2596_v38  ;;  %v2608_v44 = vsub.f32 %v6007_v21, %v2607_v26 }
 0x43e   :  { %4730 = vmatprep.subr.mxu1 %v5462_v49 }
 0x43f   :  { %4731 = vmatpush3.msra.mxu1 %v5462_v49  ;;  %4760 = vmatprep.mubr.f32.mxu1 %v2597_v43  ;;  %v2598_v58 = vsub.f32 %v2596_v38, %v2597_v43  ;;  %v2609_v7 = vand.u32 4294901760, %v2608_v44 }
 0x440   :  { %4732 = vmatprep.subr.mxu1 %v5468_v2 }
 0x441   :  { %4733 = vmatpush3.msra.mxu1 %v5468_v2  ;;  %v2599_v5 = vand.u32 4294901760, %v2598_v58 }
 0x442   :  { %4734 = vmatprep.subr.mxu1 %v5473_v36 }
 0x443   :  { %4735 = vmatpush3.msra.mxu1 %v5473_v36  ;;  %4655 = vmatprep.mubr.f32.mxu0 %v2599_v5 }
 0x444   :  { %4736 = vmatprep.subr.mxu1 %v5482_v63  ;;  %4656 = vmatmul.mubr.f32.vlgmr.msra.gmra.mxu0 %v2609_v7 }
 0x445   :  { %4694 = vmatpush3.msra.mxu0 %v5466_v59  ;;  %4737 = vmatpush3.msra.mxu1 %v5482_v63  ;;  %v6306_v59 = vld [vmem:[#allocation21_spill] sm:$0xff] }
 0x446   :  { %4695 = vmatprep.subr.mxu0 %v5471_v35  ;;  %4725 = vmatprep.mubr.f32.mxu0 %v2596_v38 }
 0x447   :  { %4738 = vmatprep.subr.mxu1 %v5490_v3  ;;  %4696 = vmatpush3.msra.mxu0 %v5471_v35  ;;  %v6308_v35 = vld [vmem:[#allocation27_spill] sm:$0xff] }
 0x448   :  { %4739 = vmatpush3.msra.mxu1 %v5490_v3  ;;  %4697 = vmatprep.subr.mxu0 %v5480_v54 }
 0x449   :  { %4740 = vmatprep.subr.mxu1 %v5504_v17  ;;  %4698 = vmatpush3.msra.mxu0 %v5480_v54  ;;  %v6311_v54 = vld [vmem:[#allocation33_spill] sm:$0xff] }
 0x44a   :  { %4741 = vmatpush3.msra.mxu1 %v5504_v17  ;;  %4699 = vmatprep.subr.mxu0 %v5488_v15 }
 0x44b   :  { %4742 = vmatprep.subr.mxu1 %v5591_v47  ;;  %4700 = vmatpush3.msra.mxu0 %v5488_v15  ;;  %v6314_v15 = vld [vmem:[#allocation39_spill] sm:$0xff] }
 0x44c   :  { %4743 = vmatpush3.msra.mxu1 %v5591_v47  ;;  %4701 = vmatprep.subr.mxu0 %v5502_v16 }
 0x44d   :  { %4744 = vmatprep.subr.mxu1 %v5596_v57  ;;  %4702 = vmatpush3.msra.mxu0 %v5502_v16 }
 0x44e   :  { %4745 = vmatpush3.msra.mxu1 %v5596_v57  ;;  %4703 = vmatprep.subr.mxu0 %v5516_v19 }
 0x44f   :  { %4746 = vmatprep.subr.mxu1 %v5606_v62  ;;  %4704 = vmatpush3.msra.mxu0 %v5516_v19 }
 0x450   :  { %4747 = vmatpush3.msra.mxu1 %v5606_v62  ;;  %4705 = vmatprep.subr.mxu0 %v5531_v23 }
 0x451   :  { %4748 = vmatprep.subr.mxu1 %v5618_v25  ;;  %4706 = vmatpush3.msra.mxu0 %v5531_v23 }
 0x452   :  { %4749 = vmatpush3.msra.mxu1 %v5618_v25  ;;  %4707 = vmatprep.subr.mxu0 %v5594_v53 }
 0x453   :  { %4750 = vmatprep.subr.mxu1 %v5633_v48  ;;  %4708 = vmatpush3.msra.mxu0 %v5594_v53 }
 0x454   :  { %4751 = vmatpush3.msra.mxu1 %v5633_v48  ;;  %4709 = vmatprep.subr.mxu0 %v5604_v61 }
 0x455   :  { %4752 = vmatprep.subr.mxu1 %v5644_v12  ;;  %4710 = vmatpush3.msra.mxu0 %v5604_v61 }
 0x456   :  { %4753 = vmatpush3.msra.mxu1 %v5644_v12  ;;  %4711 = vmatprep.subr.mxu0 %v5616_v13 }
 0x457   :  { %4754 = vmatprep.subr.mxu1 %v5659_v9  ;;  %4712 = vmatpush3.msra.mxu0 %v5616_v13 }
 0x458   :  { %4755 = vmatpush3.msra.mxu1 %v5659_v9  ;;  %4713 = vmatprep.subr.mxu0 %v5630_v40 }
 0x459   :  { %4756 = vmatprep.subr.mxu1 %v5676_v46  ;;  %4714 = vmatpush3.msra.mxu0 %v5630_v40 }
 0x45a   :  { %4757 = vmatpush3.msra.mxu1 %v5676_v46  ;;  %4715 = vmatprep.subr.mxu0 %v5648_v18 }
 0x45b   :  { %4758 = vmatprep.subr.mxu1 %v5692_v32  ;;  %4716 = vmatpush3.msra.mxu0 %v5648_v18 }
 0x45c   :  { %4759 = vmatpush3.msra.mxu1 %v5692_v32  ;;  %4717 = vmatprep.subr.mxu0 %v5657_v4 }
 0x45d   :  { %4761 = vmatmul.mubr.f32.vlgmr.msra.gmra.mxu1 %v2607_v26  ;;  %4798 = vmatprep.subr.mxu1 %v5457_v37 }
 0x45e   :  { %4718 = vmatpush3.msra.mxu0 %v5657_v4  ;;  %4799 = vmatpush3.msra.mxu1 %v5457_v37  ;;  %v6304_v37 = vld [vmem:[#allocation17_spill] sm:$0xff] }
 0x45f   :  { %4830 = vmatprep.mubr.f32.mxu1 %v6010_v29  ;;  %4719 = vmatprep.subr.mxu0 %v5674_v42 }
 0x460   :  { %4800 = vmatprep.subr.mxu1 %v5462_v49  ;;  %4720 = vmatpush3.msra.mxu0 %v5674_v42 }
 0x461   :  { %4801 = vmatpush3.msra.mxu1 %v5462_v49  ;;  %4721 = vmatprep.subr.mxu0 %v5690_v30  ;;  %v6305_v49 = vld [vmem:[#allocation19_spill] sm:$0xff] }
 0x462   :  { %4802 = vmatprep.subr.mxu1 %v5468_v2  ;;  %4722 = vmatpush3.msra.mxu0 %v5690_v30 }
 0x463   :  { %4803 = vmatpush3.msra.mxu1 %v5468_v2  ;;  %4723 = vmatprep.subr.mxu0 %v5707_v27  ;;  %v6307_v2 = vld [vmem:[#allocation26_spill] sm:$0xff] }
 0x464   :  { %4804 = vmatprep.subr.mxu1 %v5473_v36  ;;  %4724 = vmatpush3.msra.mxu0 %v5707_v27 }
 0x465   :  { %4805 = vmatpush3.msra.mxu1 %v5473_v36  ;;  %4726 = vmatmul.mubr.f32.vlgmr.msra.gmra.mxu0 %v6007_v21  ;;  %v6309_v36 = vld [vmem:[#allocation29_spill] sm:$0xff] }
 0x466   :  { %4763 = vmatprep.subr.mxu0 %v5477_v55  ;;  %4806 = vmatprep.subr.mxu1 %v5482_v63 }
 0x467   :  { %4764 = vmatpush3.msra.mxu0 %v5477_v55  ;;  %4795 = vmatprep.mubr.f32.mxu0 %v6010_v29  ;;  %v6310_v55 = vld [vmem:[#allocation31_spill] sm:$0xff]  ;;  %v3198_v29 = vmul.f32 -0.50113636, %v6003_v8 }
 0x468   :  { %4807 = vmatpush3.msra.mxu1 %v5482_v63  ;;  %4765 = vmatprep.subr.mxu0 %v5485_v14  ;;  %v6312_v63 = vld [vmem:[#allocation35_spill] sm:$0xff] }
 0x469   :  { %4808 = vmatprep.subr.mxu1 %v5490_v3  ;;  %4766 = vmatpush3.msra.mxu0 %v5485_v14  ;;  %v6313_v14 = vld [vmem:[#allocation36_spill] sm:$0xff] }
 0x46a   :  { %4809 = vmatpush3.msra.mxu1 %v5490_v3  ;;  %4767 = vmatprep.subr.mxu0 %v5499_v11  ;;  %v6315_v3 = vld [vmem:[#allocation41_spill] sm:$0xff] }
 0x46b   :  { %4810 = vmatprep.subr.mxu1 %v5504_v17  ;;  %4768 = vmatpush3.msra.mxu0 %v5499_v11  ;;  %v6316_v11 = vld [vmem:[#allocation45_spill] sm:$0xff] }
 0x46c   :  { %4811 = vmatpush3.msra.mxu1 %v5504_v17  ;;  %4769 = vmatprep.subr.mxu0 %v5513_v10 }
 0x46d   :  { %4812 = vmatprep.subr.mxu1 %v5591_v47  ;;  %4770 = vmatpush3.msra.mxu0 %v5513_v10 }
 0x46e   :  { %4813 = vmatpush3.msra.mxu1 %v5591_v47  ;;  %4771 = vmatprep.subr.mxu0 %v6304_v37 }
 0x46f   :  { %4814 = vmatprep.subr.mxu1 %v5596_v57  ;;  %4772 = vmatpush3.msra.mxu0 %v6304_v37 }
 0x470   :  { %4815 = vmatpush3.msra.mxu1 %v5596_v57  ;;  %4773 = vmatprep.subr.mxu0 %v6305_v49 }
 0x471   :  { %4816 = vmatprep.subr.mxu1 %v5606_v62  ;;  %4774 = vmatpush3.msra.mxu0 %v6305_v49 }
 0x472   :  { %4817 = vmatpush3.msra.mxu1 %v5606_v62  ;;  %4775 = vmatprep.subr.mxu0 %v6306_v59 }
 0x473   :  { %4818 = vmatprep.subr.mxu1 %v5618_v25  ;;  %4776 = vmatpush3.msra.mxu0 %v6306_v59 }
 0x474   :  { %4819 = vmatpush3.msra.mxu1 %v5618_v25  ;;  %4777 = vmatprep.subr.mxu0 %v6307_v2 }
 0x475   :  { %4820 = vmatprep.subr.mxu1 %v5633_v48  ;;  %4778 = vmatpush3.msra.mxu0 %v6307_v2 }
 0x476   :  { %4821 = vmatpush3.msra.mxu1 %v5633_v48  ;;  %4779 = vmatprep.subr.mxu0 %v6308_v35 }
 0x477   :  { %4822 = vmatprep.subr.mxu1 %v5644_v12  ;;  %4780 = vmatpush3.msra.mxu0 %v6308_v35 }
 0x478   :  { %4823 = vmatpush3.msra.mxu1 %v5644_v12  ;;  %4781 = vmatprep.subr.mxu0 %v6309_v36 }
 0x479   :  { %4824 = vmatprep.subr.mxu1 %v5659_v9  ;;  %4782 = vmatpush3.msra.mxu0 %v6309_v36 }
 0x47a   :  { %4825 = vmatpush3.msra.mxu1 %v5659_v9  ;;  %4783 = vmatprep.subr.mxu0 %v6310_v55 }
 0x47b   :  { %4826 = vmatprep.subr.mxu1 %v5676_v46  ;;  %4784 = vmatpush3.msra.mxu0 %v6310_v55 }
 0x47c   :  { %4827 = vmatpush3.msra.mxu1 %v5676_v46  ;;  %4785 = vmatprep.subr.mxu0 %v6311_v54 }
 0x47d   :  { %4828 = vmatprep.subr.mxu1 %v5692_v32  ;;  %4786 = vmatpush3.msra.mxu0 %v6311_v54 }
 0x47e   :  { %4829 = vmatpush3.msra.mxu1 %v5692_v32  ;;  %4787 = vmatprep.subr.mxu0 %v6312_v63 }
 0x47f   :  { %4831 = vmatmul.mubr.f32.vlgmr.msra.gmra.mxu1 %v6001_v22  ;;  %4788 = vmatpush3.msra.mxu0 %v6312_v63 }
 0x480   :  { %4789 = vmatprep.subr.mxu0 %v6313_v14  ;;  %4844 = vmatprep.mubr.f32.mxu1 %v5893_v1 }
 0x481   :  { %4790 = vmatpush3.msra.mxu0 %v6313_v14 }
 0x482   :  { %4791 = vmatprep.subr.mxu0 %v6314_v15 }
 0x483   :  { %4792 = vmatpush3.msra.mxu0 %v6314_v15 }
 0x484   :  { %4793 = vmatprep.subr.mxu0 %v6315_v3 }
 0x485   :  { %4794 = vmatpush3.msra.mxu0 %v6315_v3 }
 0x486   :  { %4796 = vmatmul.mubr.f32.vlgmr.msra.gmra.mxu0 %v6001_v22 }
 0x487   :  { %4837 = vmatprep.mubr.f32.mxu0 %v6316_v11 }
 0x4fc   :  { %v4692_v17 = vpop.f32.mrf.mxu1 }
 0x4fe   :  { %v2762_v23 = vpop.f32.mrf.mxu1 }
 0x504   :  { %v4657_v16 = vpop.f32.mrf.mxu0 }
 0x505   :  { %v2769_v47 = vadd.f32 %v4692_v17, %v4657_v16 }
 0x506   :  { %v2601_v10 = vpop.f32.mrf.mxu0 }
 0x507   :  { %v2763_v61 = vadd.f32 %v2762_v23, %v2601_v10 }
 0x51d   :  { %v4762_v53 = vpop.f32.mrf.mxu1 }
 0x51f   :  { %v2968_v25 = vpop.f32.mrf.mxu1 }
 0x525   :  { %v4727_v19 = vpop.f32.mrf.mxu0 }
 0x526   :  { %v2880_v62 = vadd.f32 %v4727_v19, %v2769_v47 }
 0x527   :  { %v2872_v57 = vpop.f32.mrf.mxu0 }
 0x528   :  { %v2873_v13 = vadd.f32 %v2872_v57, %v2763_v61  ;;  %v2977_v40 = vadd.f32 %v4762_v53, %v2880_v62 }
 0x52a   :  { %v2969_v4 = vadd.f32 %v2968_v25, %v2873_v13 }
 0x53f   :  { %v4832_v48 = vpop.f32.mrf.mxu1 }
 0x541   :  { %v3188_v30 = vpop.f32.mrf.mxu1 }
 0x546   :  { %v4797_v12 = vpop.f32.mrf.mxu0 }
 0x547   :  { %v3102_v18 = vadd.f32 %v4797_v12, %v2977_v40 }
 0x548   :  { %v3095_v9 = vpop.f32.mrf.mxu0 }
 0x549   :  { %v3195_v42 = vadd.f32 %v4832_v48, %v3102_v18  ;;  %v3096_v46 = vadd.f32 %v3095_v9, %v2969_v4 }
 0x54b   :  { %v3229_v32 = vand.u32 4294901760, %v3195_v42  ;;  %v3189_v27 = vadd.f32 %v3188_v30, %v3096_v46 }
 0x54d   :  { %v3317_v20 = vsub.f32 %v3195_v42, %v3229_v32  ;;  %v3232_v39 = vand.u32 4294901760, %v3189_v27  ;;  %4833 = vmatprep.subr.mxu0 %v3229_v32 }
 0x54e   :  { %4834 = vmatpush3.msra.mxu0 %v3229_v32 }
 0x54f   :  { %v3324_v31 = vsub.f32 %v3189_v27, %v3232_v39  ;;  %4835 = vmatprep.subr.mxu0 %v3232_v39  ;;  %v3318_v45 = vand.u32 4294901760, %v3317_v20 }
 0x550   :  { %4836 = vmatpush3.msra.mxu0 %v3232_v39 }
 0x551   :  { %4838 = vmatmul.mubr.f32.vlgmr.msra.gmra.mxu0 %v5918_v6  ;;  %4847 = vmatprep.subr.mxu0 %v3317_v20  ;;  %v3319_v52 = vsub.f32 %v3317_v20, %v3318_v45  ;;  %v3325_v50 = vand.u32 4294901760, %v3324_v31  ;;  %v6317_v6 = vld [vmem:[#allocation46_spill] sm:$0xff] }
 0x552   :  { %4848 = vmatpush3.msra.mxu0 %v3317_v20  ;;  %4851 = vmatprep.mubr.f32.mxu0 %v5896_v41  ;;  %v6319_v41 = vld [vmem:[#allocation47_spill] sm:$0xff] }
 0x553   :  { %4849 = vmatprep.subr.mxu0 %v3324_v31  ;;  %v3320_v56 = vand.u32 4294901760, %v3319_v52  ;;  %v3326_v0 = vsub.f32 %v3324_v31, %v3325_v50 }
 0x554   :  { %4850 = vmatpush3.msra.mxu0 %v3324_v31 }
 0x555   :  { %4840 = vmatprep.subr.mxu1 %v3320_v56  ;;  %4861 = vmatprep.subr.mxu0 %v3318_v45  ;;  %v3327_v28 = vand.u32 4294901760, %v3326_v0 }
 0x556   :  { %4841 = vmatpush3.msra.mxu1 %v3320_v56  ;;  %4852 = vmatmul.mubr.f32.vlgmr.msra.gmra.mxu0 %v5911_v34 }
 0x557   :  { %4862 = vmatpush3.msra.mxu0 %v3318_v45  ;;  %4842 = vmatprep.subr.mxu1 %v3327_v28 }
 0x558   :  { %4863 = vmatprep.subr.mxu0 %v3325_v50  ;;  %4843 = vmatpush3.msra.mxu1 %v3327_v28 }
 0x559   :  { %4864 = vmatpush3.msra.mxu0 %v3325_v50  ;;  %4845 = vmatmul.mubr.f32.vlgmr.msra.gmra.mxu1 %v6317_v6 }
 0x55a   :  { %4854 = vmatprep.subr.mxu1 %v3229_v32  ;;  %4858 = vmatprep.mubr.f32.mxu1 %v6318_v33 }
 0x55b   :  { %4855 = vmatpush3.msra.mxu1 %v3229_v32  ;;  %4865 = vmatprep.mubr.f32.mxu0 %v5893_v1 }
 0x55c   :  { %4856 = vmatprep.subr.mxu1 %v3232_v39  ;;  %4866 = vmatmul.mubr.f32.vlgmr.msra.gmra.mxu0 %v6317_v6 }
 0x55d   :  { %4857 = vmatpush3.msra.mxu1 %v3232_v39 }
 0x55e   :  { %4859 = vmatmul.mubr.f32.vlgmr.msra.gmra.mxu1 %v6319_v41  ;;  %4868 = vmatprep.subr.mxu1 %v3229_v32 }
 0x55f   :  { %4869 = vmatpush3.msra.mxu1 %v3229_v32  ;;  %4872 = vmatprep.mubr.f32.mxu1 %v5893_v1 }
 0x560   :  { %4870 = vmatprep.subr.mxu1 %v3232_v39 }
 0x561   :  { %4871 = vmatpush3.msra.mxu1 %v3232_v39 }
 0x562   :  { %4873 = vmatmul.mubr.f32.vlgmr.msra.gmra.mxu1 %v6317_v6 }
 0x611   :  { %v4839_v34 = vpop.f32.mrf.mxu0 }
 0x612   :  { %v3284_v21 = vadd.f32 %v4839_v34, %v3199_v51 }
 0x613   :  { %v3273_v24 = vpop.f32.mrf.mxu0 }
 0x614   :  { %v3274_v38 = vadd.f32 %v3273_v24, %v3198_v29 }
 0x616   :  { %v4853_v22 = vpop.f32.mrf.mxu0 }
 0x618   :  { %v3446_v44 = vpop.f32.mrf.mxu0 }
 0x619   :  { %v4846_v26 = vpop.f32.mrf.mxu1 }
 0x61a   :  { %v3371_v43 = vadd.f32 %v4846_v26, %v3284_v21 }
 0x61b   :  { %v3364_v58 = vpop.f32.mrf.mxu1 }
 0x61c   :  { %v3454_v5 = vadd.f32 %v4853_v22, %v3371_v43  ;;  %v3365_v7 = vadd.f32 %v3364_v58, %v3274_v38  ;;  %v4867_v49 = vpop.f32.mrf.mxu0 }
 0x61e   :  { %v3447_v1 = vadd.f32 %v3446_v44, %v3365_v7  ;;  %v4860_v37 = vpop.f32.mrf.mxu1  ;;  %v3613_v55 = vpop.f32.mrf.mxu0 }
 0x61f   :  { %v3537_v59 = vadd.f32 %v4860_v37, %v3454_v5 }
 0x620   :  { %v3528_v2 = vpop.f32.mrf.mxu1 }
 0x621   :  { %v3620_v35 = vadd.f32 %v4867_v49, %v3537_v59  ;;  %v3529_v36 = vadd.f32 %v3528_v2, %v3447_v1 }
 0x622   :  { %v4874_v60 = vpop.f32.mrf.mxu1 }
 0x623   :  { %v3614_v54 = vadd.f32 %v3613_v55, %v3529_v36  ;;  %v3699_v8 = vadd.f32 %v4874_v60, %v3620_v35 }
 0x624   :  { %v3692_v63 = vpop.f32.mrf.mxu1 }
 0x625   :  { %3703 = vst [vmem:[#allocation11 + $0x8] sm:$0xff] %v3699_v8  ;;  %v3693_v14 = vadd.f32 %v3692_v63, %v3614_v54 }
 0x627   :  { %3702 = vst [vmem:[#allocation11] sm:$0xff] %v3693_v14 }
 0x628   :  { %4994 = shalt.err (!%p4991_p1)
}
 0x629   :  { %3715 = dma.vmem_to_hbm [thread:$0]  %s3710_s4, 256, %s6178_s5, [#allocation4], %s5013_s23, %s5013_s23, %s5014_s24  }
 0x62a   :  { %5009 = dma.done.wait [#allocation4], 256  }
 0x62b   :  { %5010 = vsyncadd [#allocation4], 4294967040 }
 0x62c   :  { %3719 = vsyncpa [#allocation3], 1 }
 0x62d   :  { %3720 = vsyncpa [#allocation6], 1 }
 0x62e   :  { %3721 = vsyncpa [#allocation9], 1 }
 0x62f   :  { %3722 = vsyncpa [#allocation4], 1 }

</bundles_post_ra>
